<compile_context>
chip_gen: v7x
topology: tpu7x:2x2x1
jax: 0.10.0
libtpu: 0.0.40
codegen_flags: <defaults>
</compile_context>

<pallas_src>
import math

import jax
import jax.numpy as jnp
from jax.experimental import pallas as pl
from jax.experimental.pallas import tpu as pltpu


# ----------------------------------------------------------------------------
# small helpers
# ----------------------------------------------------------------------------
def _round_up(x, m):
    return ((x + m - 1) // m) * m


def _cdiv(a, b):
    return (a + b - 1) // b


def _pad_axis(x, axis, target):
    pad = target - x.shape[axis]
    if pad <= 0:
        return x
    widths = [(0, 0)] * x.ndim
    widths[axis] = (0, pad)
    return jnp.pad(x, widths)


def _nbytes(*arrs):
    return int(sum(int(a.size) * a.dtype.itemsize for a in arrs))


def _choose_packing(num_graphs, n_pad, target_tile_rows=256):
    """How many graphs to pack per block-diagonal tile."""
    gpt = max(1, target_tile_rows // n_pad)
    if num_graphs >= 2:
        # keep >= 2 grid steps so both v7x TensorCores get work
        gpt = min(gpt, (num_graphs + 1) // 2)
    gpt = max(1, gpt)
    num_tiles = _cdiv(num_graphs, gpt)
    return gpt, num_tiles


# ----------------------------------------------------------------------------
# the single fused kernel:
#   GCN stack (per packed block-diagonal tile)  ->  sender/receiver gather
#   ->  classifier MLP with folded BN           ->  (graphs_per_tile, C) out
# ----------------------------------------------------------------------------
def _make_fused_kernel(num_layers, gpt):
    def kernel(*args):
        sidx_ref, ridx_ref = args[0], args[1]            # SMEM scalar prefetch
        h_ref, a_ref, txf_ref = args[2], args[3], args[4]
        base = 5
        w_refs = args[base:base + num_layers]
        b_refs = args[base + num_layers:base + 2 * num_layers]
        cbase = base + 2 * num_layers
        (wtx_ref, btx_ref, w1s_ref, w1r_ref, w1t_ref,
         bn1s_ref, bn1b_ref, w2_ref, bn2s_ref, bn2b_ref,
         w3_ref, b3_ref) = args[cbase:cbase + 12]
        o_ref = args[cbase + 12]
        h_scr, s_scr, r_scr = args[cbase + 13:cbase + 16]

        f32 = jnp.float32
        bf16 = jnp.bfloat16
        t = pl.program_id(0)

        # ---- GCN stack: H@W and A@(HW) both on the MXU, all VMEM-resident ----
        # NOTE: padded node rows hold relu(bias) after each layer; this is
        # mathematically masked because A's padded columns are zero and the
        # sender/receiver gather only touches real rows.
        a = a_ref[...]
        h = h_ref[...]
        y = None
        for li in range(num_layers):
            xw = jnp.dot(h, w_refs[li][...], preferred_element_type=f32)
            y = jnp.dot(a, xw.astype(bf16), preferred_element_type=f32)
            y = jnp.maximum(y + b_refs[li][...], 0.0)
            if li + 1 < num_layers:
                h = y.astype(bf16)
        h_scr[...] = y                     # final activations (tile_rows, Dh_pad) f32

        # ---- gather target sender / receiver rows for this tile's graphs ----
        s_scr[...] = jnp.zeros_like(s_scr)
        r_scr[...] = jnp.zeros_like(r_scr)
        for j in range(gpt):               # gpt is small & static -> unrolled
            srow = sidx_ref[t * gpt + j]
            rrow = ridx_ref[t * gpt + j]
            s_scr[pl.ds(j, 1), :] = h_scr[pl.ds(srow, 1), :]
            r_scr[pl.ds(j, 1), :] = h_scr[pl.ds(rrow, 1), :]

        snd = s_scr[...].astype(bf16)
        rcv = r_scr[...].astype(bf16)

        # ---- classifier head (BN folded to scale/shift, dropout = identity) --
        txe = jnp.dot(txf_ref[...], wtx_ref[...], preferred_element_type=f32)
        txe = jnp.maximum(txe + btx_ref[...], 0.0)
        acc1 = jnp.dot(snd, w1s_ref[...], preferred_element_type=f32)
        acc1 = acc1 + jnp.dot(rcv, w1r_ref[...], preferred_element_type=f32)
        acc1 = acc1 + jnp.dot(txe.astype(bf16), w1t_ref[...],
                              preferred_element_type=f32)
        x1 = jnp.maximum(acc1 * bn1s_ref[...] + bn1b_ref[...], 0.0)
        acc2 = jnp.dot(x1.astype(bf16), w2_ref[...], preferred_element_type=f32)
        x2 = jnp.maximum(acc2 * bn2s_ref[...] + bn2b_ref[...], 0.0)
        out = jnp.dot(x2.astype(bf16), w3_ref[...], preferred_element_type=f32)
        o_ref[...] = out + b3_ref[...]

    return kernel


def fused_forward(pp, packed):
    num_tiles = packed["num_tiles"]
    gpt = packed["gpt"]
    gpt_pad = packed["gpt_pad"]
    tile_rows = packed["tile_rows"]
    h, a, txf = packed["h"], packed["a"], packed["txf"]
    Din_pad = h.shape[2]
    Dh_pad, Tx_pad, F_pad = pp["dh_pad"], pp["tx_pad"], pp["f_pad"]
    H1_pad, H2_pad, C_pad = pp["h1_pad"], pp["h2_pad"], pp["c_pad"]
    num_layers = len(pp["convs"])
    assert num_layers >= 1

    def tile_spec(shape):      # per-tile block, leading tile dim squeezed away
        return pl.BlockSpec((pl.Squeezed(),) + shape, lambda t, s, r: (t, 0, 0))

    def const_spec(shape):     # whole-array resident operand (weights / biases)
        return pl.BlockSpec(shape, lambda t, s, r: (0,) * len(shape))

    in_specs = [tile_spec((tile_rows, Din_pad)),
                tile_spec((tile_rows, tile_rows)),
                tile_spec((gpt_pad, F_pad))]
    operands = [h, a, txf]
    for (w_p, _) in pp["convs"]:
        in_specs.append(const_spec(w_p.shape))
        operands.append(w_p)
    for (_, b_p) in pp["convs"]:
        in_specs.append(const_spec(b_p.shape))
        operands.append(b_p)
    cls = [pp["tx_w"], pp["tx_b"], pp["w1s"], pp["w1r"], pp["w1t"],
           pp["bn1_scale"], pp["bn1_shift"], pp["w2"], pp["bn2_scale"],
           pp["bn2_shift"], pp["w3"], pp["b3"]]
    for arr in cls:
        in_specs.append(const_spec(arr.shape))
        operands.append(arr)

    out_shape = jax.ShapeDtypeStruct((num_tiles, gpt_pad, C_pad), jnp.float32)
    out_spec = tile_spec((gpt_pad, C_pad))
    scratch = [pltpu.VMEM((tile_rows, Dh_pad), jnp.float32),
               pltpu.VMEM((gpt_pad, Dh_pad), jnp.float32),
               pltpu.VMEM((gpt_pad, Dh_pad), jnp.float32)]

    # --- cost hint + VMEM budget computed from the actual working set -------
    flops_gcn, in_dim = 0, Din_pad
    for _ in range(num_layers):
        flops_gcn += 2 * tile_rows * in_dim * Dh_pad
        flops_gcn += 2 * tile_rows * tile_rows * Dh_pad
        in_dim = Dh_pad
    flops_cls = 2 * gpt_pad * (F_pad * Tx_pad + 2 * Dh_pad * H1_pad
                               + Tx_pad * H1_pad + H1_pad * H2_pad
                               + H2_pad * C_pad)
    flops = num_tiles * (flops_gcn + flops_cls)
    bytes_accessed = _nbytes(*operands) + int(num_tiles * gpt_pad * C_pad * 4)

    tile_bytes = (tile_rows * Din_pad * 2 + tile_rows * tile_rows * 2
                  + gpt_pad * F_pad * 2 + gpt_pad * C_pad * 4)
    weight_bytes = _nbytes(*operands[3:])
    scratch_bytes = (tile_rows + 2 * gpt_pad) * Dh_pad * 4
    vmem_limit = int(2 * (tile_bytes + weight_bytes) + scratch_bytes + (8 << 20))

    grid_spec = pltpu.PrefetchScalarGridSpec(
        num_scalar_prefetch=2,
        grid=(num_tiles,),
        in_specs=in_specs,
        out_specs=out_spec,
        scratch_shapes=scratch)

    out = pl.pallas_call(
        _make_fused_kernel(num_layers, gpt),
        out_shape=out_shape,
        grid_spec=grid_spec,
        compiler_params=pltpu.CompilerParams(
            dimension_semantics=("parallel",),
            vmem_limit_bytes=vmem_limit),
        cost_estimate=pl.CostEstimate(
            flops=flops, transcendentals=0, bytes_accessed=bytes_accessed),
    )(packed["sidx"], packed["ridx"], *operands)

    G = packed["num_graphs"]
    out = out[:, :gpt, :].reshape(num_tiles * gpt, C_pad)
    return out[:G, :pp["num_classes"]]


# ----------------------------------------------------------------------------
# Packing: embeddings + PyG-style gcn_norm adjacency, built directly as packed
# block-diagonal bf16 tiles (several graphs per tile).
#   A[t, dst_row, src_row] = dinv[dst] * w * dinv[src]   (self loops weight 1)
# ----------------------------------------------------------------------------
def pack_batch(pp, data, *, n_pad, gpt, num_tiles):
    ids = data["x_node_global_ids"].astype(jnp.int32)
    ptr = data["ptr"].astype(jnp.int32)
    N = ids.shape[0]
    G = ptr.shape[0] - 1
    tile_rows = gpt * n_pad
    Gp = num_tiles * gpt
    bf16 = jnp.bfloat16

    node = jnp.arange(N, dtype=jnp.int32)
    node_g = (jnp.searchsorted(ptr, node, side="right") - 1).astype(jnp.int32)
    node_l = node - ptr[node_g]
    node_t = node_g // gpt
    node_r = (node_g % gpt) * n_pad + node_l

    # node features: embedding rows, lane-padded to 128 with zero columns
    Din_pad = pp["din_pad"]
    h_rows = jnp.take(pp["account_embedding"], ids, axis=0)
    h_rows = _pad_axis(h_rows, 1, Din_pad).astype(bf16)
    h = jnp.zeros((num_tiles, tile_rows, Din_pad), bf16)
    h = h.at[node_t, node_r].set(h_rows)

    # normalized adjacency, emitted directly in bf16 (no f32 materialize+cast)
    src = data["edge_index"][0].astype(jnp.int32)
    dst = data["edge_index"][1].astype(jnp.int32)
    w = data["edge_weight"].astype(jnp.float32)
    edge_g = (jnp.searchsorted(ptr, dst, side="right") - 1).astype(jnp.int32)
    src_l = src - ptr[edge_g]          # assumes edges never cross graphs
    dst_l = dst - ptr[edge_g]
    edge_t = edge_g // gpt
    row_s = (edge_g % gpt) * n_pad + src_l
    row_d = (edge_g % gpt) * n_pad + dst_l
    deg = jnp.zeros((N,), jnp.float32).at[dst].add(w) + 1.0   # + self loop (w=1)
    dinv = jax.lax.rsqrt(deg)
    norm_e = (dinv[src] * w * dinv[dst]).astype(bf16)
    norm_s = (dinv * dinv).astype(bf16)
    a = jnp.zeros((num_tiles, tile_rows, tile_rows), bf16)
    a = a.at[edge_t, row_d, row_s].add(norm_e)
    a = a.at[node_t, node_r, node_r].add(norm_s)

    # target tx features packed per tile, lane-padded to 128
    gpt_pad = _round_up(gpt, 8)
    F_pad = pp["f_pad"]
    txf = _pad_axis(data["target_tx_features"].astype(jnp.float32), 1, F_pad)
    txf = _pad_axis(txf, 0, Gp).astype(bf16)
    txf = _pad_axis(txf.reshape(num_tiles, gpt, F_pad), 1, gpt_pad)

    # packed per-tile row index of each graph's target sender / receiver
    g = jnp.arange(Gp, dtype=jnp.int32)
    s_loc = _pad_axis(data["target_sender_local_idx"].astype(jnp.int32), 0, Gp)
    r_loc = _pad_axis(data["target_receiver_local_idx"].astype(jnp.int32), 0, Gp)
    sidx = (g % gpt) * n_pad + s_loc
    ridx = (g % gpt) * n_pad + r_loc

    return {"h": h, "a": a, "txf": txf, "sidx": sidx, "ridx": ridx,
            "num_tiles": num_tiles, "gpt": gpt, "gpt_pad": gpt_pad,
            "tile_rows": tile_rows, "n_pad": n_pad, "num_graphs": G}


def gcn_norm_dense(edge_index, edge_weight, num_nodes):
    """Dense N x N PyG-style gcn_norm (structural sanity check only)."""
    src, dst = edge_index[0], edge_index[1]
    loop = jnp.arange(num_nodes, dtype=src.dtype)
    src = jnp.concatenate([src, loop])
    dst = jnp.concatenate([dst, loop])
    w = jnp.concatenate([edge_weight.astype(jnp.float32),
                         jnp.ones((num_nodes,), jnp.float32)])
    deg = jnp.zeros((num_nodes,), jnp.float32).at[dst].add(w)
    dinv = jnp.where(deg > 0, jax.lax.rsqrt(deg), 0.0)
    norm = dinv[src] * w * dinv[dst]
    return jnp.zeros((num_nodes, num_nodes), jnp.float32).at[dst, src].add(norm)


# ----------------------------------------------------------------------------
# Parameters (same shapes as the nn.Module __init__), BN fold, lane padding
# ----------------------------------------------------------------------------
def init_params(key, *, num_total_accounts, account_embedding_dim,
                num_transaction_features, transaction_embedding_dim,
                gnn_hidden_dim, gnn_layers, num_classes=1):
    ks = iter(jax.random.split(key, 4 + 2 * gnn_layers + 8))
    p = {}
    p["account_embedding"] = jax.random.normal(
        next(ks), (num_total_accounts, account_embedding_dim), jnp.float32)
    p["tx_w"] = 0.1 * jax.random.normal(
        next(ks), (num_transaction_features, transaction_embedding_dim), jnp.float32)
    p["tx_b"] = 0.1 * jax.random.normal(next(ks), (transaction_embedding_dim,), jnp.float32)
    p["convs"] = []
    cur = account_embedding_dim
    for _ in range(gnn_layers):
        w = 0.1 * jax.random.normal(next(ks), (cur, gnn_hidden_dim), jnp.float32)
        b = 0.1 * jax.random.normal(next(ks), (gnn_hidden_dim,), jnp.float32)
        p["convs"].append((w, b))
        cur = gnn_hidden_dim
    h2 = gnn_hidden_dim // 2
    eps = 1e-5

    def bn_init(dim):
        return (jnp.ones((dim,), jnp.float32), jnp.zeros((dim,), jnp.float32),
                jnp.zeros((dim,), jnp.float32), jnp.ones((dim,), jnp.float32), eps)

    cls_in = gnn_hidden_dim * 2 + transaction_embedding_dim
    p["cls1_w"] = 0.1 * jax.random.normal(next(ks), (cls_in, gnn_hidden_dim), jnp.float32)
    p["cls1_b"] = 0.1 * jax.random.normal(next(ks), (gnn_hidden_dim,), jnp.float32)
    p["bn1"] = bn_init(gnn_hidden_dim)
    p["cls2_w"] = 0.1 * jax.random.normal(next(ks), (gnn_hidden_dim, h2), jnp.float32)
    p["cls2_b"] = 0.1 * jax.random.normal(next(ks), (h2,), jnp.float32)
    p["bn2"] = bn_init(h2)
    p["cls3_w"] = 0.1 * jax.random.normal(next(ks), (h2, num_classes), jnp.float32)
    p["cls3_b"] = 0.1 * jax.random.normal(next(ks), (num_classes,), jnp.float32)
    return p


def _fold_bn(linear_bias, bn):
    gamma, beta, mean, var, eps = bn
    s = gamma * jax.lax.rsqrt(var + eps)
    return s, (linear_bias - mean) * s + beta


def prepare_params(p, *, gnn_hidden_dim, transaction_embedding_dim,
                   num_transaction_features, num_classes):
    """Fold eval-mode BN, lane-pad all dims to multiples of 128 with zero pad
    (a mathematical no-op), split the classifier's first weight by concat
    segment, and cast MXU operands to bf16."""
    bf16, f32 = jnp.bfloat16, jnp.float32
    Din = p["account_embedding"].shape[1]
    Din_pad = _round_up(Din, 128)
    Dh = gnn_hidden_dim
    Dh_pad = _round_up(Dh, 128)
    Tx = transaction_embedding_dim
    Tx_pad = _round_up(Tx, 128)
    F_pad = _round_up(num_transaction_features, 128)
    H2 = Dh // 2
    H2_pad = _round_up(H2, 128)
    C_pad = _round_up(num_classes, 128)

    pp = {"account_embedding": p["account_embedding"], "num_classes": num_classes,
          "din_pad": Din_pad, "f_pad": F_pad, "dh_pad": Dh_pad, "tx_pad": Tx_pad,
          "h1_pad": Dh_pad, "h2_pad": H2_pad, "c_pad": C_pad}

    convs = []
    for li, (w, b) in enumerate(p["convs"]):
        in_pad = Din_pad if li == 0 else Dh_pad
        w_p = _pad_axis(_pad_axis(w, 0, in_pad), 1, Dh_pad).astype(bf16)
        b_p = _pad_axis(b, 0, Dh_pad).reshape(1, Dh_pad).astype(f32)
        convs.append((w_p, b_p))
    pp["convs"] = convs

    pp["tx_w"] = _pad_axis(_pad_axis(p["tx_w"], 0, F_pad), 1, Tx_pad).astype(bf16)
    pp["tx_b"] = _pad_axis(p["tx_b"], 0, Tx_pad).reshape(1, Tx_pad).astype(f32)

    w1 = _pad_axis(p["cls1_w"], 1, Dh_pad)        # rows: [sender | receiver | tx]
    pp["w1s"] = _pad_axis(w1[:Dh], 0, Dh_pad).astype(bf16)
    pp["w1r"] = _pad_axis(w1[Dh:2 * Dh], 0, Dh_pad).astype(bf16)
    pp["w1t"] = _pad_axis(w1[2 * Dh:], 0, Tx_pad).astype(bf16)
    s1, sh1 = _fold_bn(p["cls1_b"], p["bn1"])
    pp["bn1_scale"] = _pad_axis(s1, 0, Dh_pad).reshape(1, Dh_pad).astype(f32)
    pp["bn1_shift"] = _pad_axis(sh1, 0, Dh_pad).reshape(1, Dh_pad).astype(f32)

    pp["w2"] = _pad_axis(_pad_axis(p["cls2_w"], 0, Dh_pad), 1, H2_pad).astype(bf16)
    s2, sh2 = _fold_bn(p["cls2_b"], p["bn2"])
    pp["bn2_scale"] = _pad_axis(s2, 0, H2_pad).reshape(1, H2_pad).astype(f32)
    pp["bn2_shift"] = _pad_axis(sh2, 0, H2_pad).reshape(1, H2_pad).astype(f32)

    pp["w3"] = _pad_axis(_pad_axis(p["cls3_w"], 0, H2_pad), 1, C_pad).astype(bf16)
    pp["b3"] = _pad_axis(p["cls3_b"], 0, C_pad).reshape(1, C_pad).astype(f32)
    return pp


# ----------------------------------------------------------------------------
# Pure-JAX reference with identical math / dtype casts (no Pallas)
# ----------------------------------------------------------------------------
def forward_ref(pp, packed):
    f32, bf16 = jnp.float32, jnp.bfloat16
    h, a = packed["h"], packed["a"]
    num_layers = len(pp["convs"])
    for li, (w, b) in enumerate(pp["convs"]):
        xw = jnp.einsum("tnk,kd->tnd", h, w, preferred_element_type=f32)
        y = jnp.einsum("tnm,tmd->tnd", a, xw.astype(bf16),
                       preferred_element_type=f32)
        y = jnp.maximum(y + b, 0.0)
        h = y.astype(bf16) if li + 1 < num_layers else y

    num_tiles, tile_rows, Dh_pad = h.shape
    gpt = packed["gpt"]
    Gp = num_tiles * gpt
    flat = h.reshape(num_tiles * tile_rows, Dh_pad)
    tile_of = jnp.arange(Gp, dtype=jnp.int32) // gpt
    snd = flat[tile_of * tile_rows + packed["sidx"]].astype(bf16)
    rcv = flat[tile_of * tile_rows + packed["ridx"]].astype(bf16)
    txf = packed["txf"][:, :gpt].reshape(Gp, -1)

    txe = jnp.maximum(jnp.dot(txf, pp["tx_w"], preferred_element_type=f32)
                      + pp["tx_b"], 0.0)
    acc1 = (jnp.dot(snd, pp["w1s"], preferred_element_type=f32)
            + jnp.dot(rcv, pp["w1r"], preferred_element_type=f32)
            + jnp.dot(txe.astype(bf16), pp["w1t"], preferred_element_type=f32))
    x1 = jnp.maximum(acc1 * pp["bn1_scale"] + pp["bn1_shift"], 0.0)
    acc2 = jnp.dot(x1.astype(bf16), pp["w2"], preferred_element_type=f32)
    x2 = jnp.maximum(acc2 * pp["bn2_scale"] + pp["bn2_shift"], 0.0)
    out = jnp.dot(x2.astype(bf16), pp["w3"], preferred_element_type=f32) + pp["b3"]
    G = packed["num_graphs"]
    return out[:G, :pp["num_classes"]]


# ----------------------------------------------------------------------------
if __name__ == "__main__":
    NUM_TOTAL_ACCOUNTS = 64
    ACCOUNT_EMB_DIM = 16
    NUM_TX_FEATURES = 8
    TX_EMB_DIM = 16
    GNN_HIDDEN = 32
    GNN_LAYERS = 2
    NUM_CLASSES = 1

    NUM_GRAPHS = 4
    NODES_PER_GRAPH = 8
    EDGES_PER_GRAPH = 12
    N = NUM_GRAPHS * NODES_PER_GRAPH

    key = jax.random.PRNGKey(0)
    k_param, k_ids, k_src, k_dst, k_w, k_snd, k_rcv, k_tx = jax.random.split(key, 8)

    params = init_params(
        k_param,
        num_total_accounts=NUM_TOTAL_ACCOUNTS,
        account_embedding_dim=ACCOUNT_EMB_DIM,
        num_transaction_features=NUM_TX_FEATURES,
        transaction_embedding_dim=TX_EMB_DIM,
        gnn_hidden_dim=GNN_HIDDEN,
        gnn_layers=GNN_LAYERS,
        num_classes=NUM_CLASSES,
    )
    pp = prepare_params(params, gnn_hidden_dim=GNN_HIDDEN,
                        transaction_embedding_dim=TX_EMB_DIM,
                        num_transaction_features=NUM_TX_FEATURES,
                        num_classes=NUM_CLASSES)

    # batched PyG-style graph data (edges never cross graphs)
    node_global_ids = jax.random.randint(k_ids, (N,), 0, NUM_TOTAL_ACCOUNTS)
    per_graph_off = jnp.repeat(jnp.arange(NUM_GRAPHS) * NODES_PER_GRAPH, EDGES_PER_GRAPH)
    src = jax.random.randint(k_src, (NUM_GRAPHS * EDGES_PER_GRAPH,), 0, NODES_PER_GRAPH) + per_graph_off
    dst = jax.random.randint(k_dst, (NUM_GRAPHS * EDGES_PER_GRAPH,), 0, NODES_PER_GRAPH) + per_graph_off
    edge_index = jnp.stack([src, dst], axis=0).astype(jnp.int32)
    edge_weight = jax.random.uniform(k_w, (NUM_GRAPHS * EDGES_PER_GRAPH,),
                                     minval=0.1, maxval=5.0)

    data = {
        "x_node_global_ids": node_global_ids.astype(jnp.int32),
        "edge_index": edge_index,
        "edge_weight": edge_weight,
        "ptr": jnp.arange(NUM_GRAPHS + 1, dtype=jnp.int32) * NODES_PER_GRAPH,
        "target_sender_local_idx": jax.random.randint(k_snd, (NUM_GRAPHS,), 0, NODES_PER_GRAPH),
        "target_receiver_local_idx": jax.random.randint(k_rcv, (NUM_GRAPHS,), 0, NODES_PER_GRAPH),
        "target_tx_features": jax.random.normal(k_tx, (NUM_GRAPHS, NUM_TX_FEATURES), jnp.float32),
    }

    # correctness guard: every edge must stay within one graph
    g_src = jnp.searchsorted(data["ptr"], edge_index[0], side="right") - 1
    g_dst = jnp.searchsorted(data["ptr"], edge_index[1], side="right") - 1
    assert bool(jnp.all(g_src == g_dst)), "edges must not cross graph boundaries"

    # max graph size padded to 16 (bf16 sublane packing), then graph packing
    n_pad = _round_up(int(jnp.max(jnp.diff(data["ptr"]))), 16)
    gpt, num_tiles = _choose_packing(NUM_GRAPHS, n_pad, target_tile_rows=256)

    packed = pack_batch(pp, data, n_pad=n_pad, gpt=gpt, num_tiles=num_tiles)

    # sanity: packed block-diagonal A_hat == dense PyG-style gcn_norm
    a_dense = gcn_norm_dense(edge_index, edge_weight, N)
    a_rebuilt = jnp.zeros((N, N), jnp.float32)
    for g in range(NUM_GRAPHS):
        t, off = g // gpt, (g % gpt) * n_pad
        blk = packed["a"][t, off:off + NODES_PER_GRAPH,
                          off:off + NODES_PER_GRAPH].astype(jnp.float32)
        sl = slice(g * NODES_PER_GRAPH, (g + 1) * NODES_PER_GRAPH)
        a_rebuilt = a_rebuilt.at[sl, sl].set(blk)
    assert jnp.allclose(a_rebuilt, a_dense, atol=2e-2), "packed A_hat mismatch"

    out = jax.block_until_ready(fused_forward(pp, packed))
    assert out.shape == (NUM_GRAPHS, NUM_CLASSES), out.shape

    ref = jax.block_until_ready(forward_ref(pp, packed))
    assert jnp.allclose(out, ref, rtol=2e-2, atol=2e-2), (out, ref)

    print("KERNEL_OK")
</pallas_src>

<mosaic_0001>
module attributes {stable_mosaic.version = 11 : i64} {
  func.func @kernel(%arg0: i32, %arg1: memref<4xi32, #tpu.memory_space<smem>>, %arg2: memref<4xi32, #tpu.memory_space<smem>>, %arg3: memref<1x32x128xbf16, #tpu.memory_space<vmem>>, %arg4: memref<1x32x32xbf16, #tpu.memory_space<vmem>>, %arg5: memref<1x8x128xbf16, #tpu.memory_space<vmem>>, %arg6: memref<128x128xbf16, #tpu.memory_space<vmem>>, %arg7: memref<128x128xbf16, #tpu.memory_space<vmem>>, %arg8: memref<1x128xf32, #tpu.memory_space<vmem>>, %arg9: memref<1x128xf32, #tpu.memory_space<vmem>>, %arg10: memref<128x128xbf16, #tpu.memory_space<vmem>>, %arg11: memref<1x128xf32, #tpu.memory_space<vmem>>, %arg12: memref<128x128xbf16, #tpu.memory_space<vmem>>, %arg13: memref<128x128xbf16, #tpu.memory_space<vmem>>, %arg14: memref<128x128xbf16, #tpu.memory_space<vmem>>, %arg15: memref<1x128xf32, #tpu.memory_space<vmem>>, %arg16: memref<1x128xf32, #tpu.memory_space<vmem>>, %arg17: memref<128x128xbf16, #tpu.memory_space<vmem>>, %arg18: memref<1x128xf32, #tpu.memory_space<vmem>>, %arg19: memref<1x128xf32, #tpu.memory_space<vmem>>, %arg20: memref<128x128xbf16, #tpu.memory_space<vmem>>, %arg21: memref<1x128xf32, #tpu.memory_space<vmem>>, %arg22: memref<1x8x128xf32, #tpu.memory_space<vmem>>, %arg23: memref<32x128xf32, #tpu.memory_space<vmem>>, %arg24: memref<8x128xf32, #tpu.memory_space<vmem>>, %arg25: memref<8x128xf32, #tpu.memory_space<vmem>>) attributes {dimension_semantics = [#tpu.dimension_semantics<parallel>], iteration_bounds = array<i64: 2>, scalar_prefetch = 2 : i64, scratch_operands = 3 : i64, tpu.core_type = #tpu.core_type<tc>, window_params = [{transform_indices = @transform_0, window_bounds = array<i64: 1, 32, 128>}, {transform_indices = @transform_1, window_bounds = array<i64: 1, 32, 32>}, {transform_indices = @transform_2, window_bounds = array<i64: 1, 8, 128>}, {pipeline_mode = #tpu.pipeline_mode<synchronous>, transform_indices = @transform_3, window_bounds = array<i64: 128, 128>}, {pipeline_mode = #tpu.pipeline_mode<synchronous>, transform_indices = @transform_4, window_bounds = array<i64: 128, 128>}, {pipeline_mode = #tpu.pipeline_mode<synchronous>, transform_indices = @transform_5, window_bounds = array<i64: 1, 128>}, {pipeline_mode = #tpu.pipeline_mode<synchronous>, transform_indices = @transform_6, window_bounds = array<i64: 1, 128>}, {pipeline_mode = #tpu.pipeline_mode<synchronous>, transform_indices = @transform_7, window_bounds = array<i64: 128, 128>}, {pipeline_mode = #tpu.pipeline_mode<synchronous>, transform_indices = @transform_8, window_bounds = array<i64: 1, 128>}, {pipeline_mode = #tpu.pipeline_mode<synchronous>, transform_indices = @transform_9, window_bounds = array<i64: 128, 128>}, {pipeline_mode = #tpu.pipeline_mode<synchronous>, transform_indices = @transform_10, window_bounds = array<i64: 128, 128>}, {pipeline_mode = #tpu.pipeline_mode<synchronous>, transform_indices = @transform_11, window_bounds = array<i64: 128, 128>}, {pipeline_mode = #tpu.pipeline_mode<synchronous>, transform_indices = @transform_12, window_bounds = array<i64: 1, 128>}, {pipeline_mode = #tpu.pipeline_mode<synchronous>, transform_indices = @transform_13, window_bounds = array<i64: 1, 128>}, {pipeline_mode = #tpu.pipeline_mode<synchronous>, transform_indices = @transform_14, window_bounds = array<i64: 128, 128>}, {pipeline_mode = #tpu.pipeline_mode<synchronous>, transform_indices = @transform_15, window_bounds = array<i64: 1, 128>}, {pipeline_mode = #tpu.pipeline_mode<synchronous>, transform_indices = @transform_16, window_bounds = array<i64: 1, 128>}, {pipeline_mode = #tpu.pipeline_mode<synchronous>, transform_indices = @transform_17, window_bounds = array<i64: 128, 128>}, {pipeline_mode = #tpu.pipeline_mode<synchronous>, transform_indices = @transform_18, window_bounds = array<i64: 1, 128>}, {transform_indices = @transform_19, window_bounds = array<i64: 1, 8, 128>}]} {
    %c0 = arith.constant 0 : index
    %c0_0 = arith.constant 0 : index
    %c0_1 = arith.constant 0 : index
    %0 = vector.load %arg4[%c0, %c0_0, %c0_1] : memref<1x32x32xbf16, #tpu.memory_space<vmem>>, vector<1x32x32xbf16>
    %1 = vector.shape_cast %0 : vector<1x32x32xbf16> to vector<32x32xbf16>
    %c0_2 = arith.constant 0 : index
    %c0_3 = arith.constant 0 : index
    %c0_4 = arith.constant 0 : index
    %2 = vector.load %arg3[%c0_2, %c0_3, %c0_4] : memref<1x32x128xbf16, #tpu.memory_space<vmem>>, vector<1x32x128xbf16>
    %3 = vector.shape_cast %2 : vector<1x32x128xbf16> to vector<32x128xbf16>
    %c0_5 = arith.constant 0 : index
    %c0_6 = arith.constant 0 : index
    %4 = vector.load %arg6[%c0_5, %c0_6] : memref<128x128xbf16, #tpu.memory_space<vmem>>, vector<128x128xbf16>
    %cst = arith.constant dense<0.000000e+00> : vector<32x128xf32>
    %5 = tpu.matmul %3, %4, %cst {dimension_numbers = #tpu.dot_dimension_numbers<[1], [0], [0], [1], [0, 0, 1, 1], [], []>} : vector<32x128xbf16>, vector<128x128xbf16>, vector<32x128xf32> -> vector<32x128xf32>
    %6 = arith.truncf %5 : vector<32x128xf32> to vector<32x128xbf16>
    %cst_7 = arith.constant dense<0.000000e+00> : vector<32x128xf32>
    %7 = tpu.matmul %1, %6, %cst_7 {dimension_numbers = #tpu.dot_dimension_numbers<[1], [0], [0], [1], [0, 0, 1, 1], [], []>} : vector<32x32xbf16>, vector<32x128xbf16>, vector<32x128xf32> -> vector<32x128xf32>
    %c0_8 = arith.constant 0 : index
    %c0_9 = arith.constant 0 : index
    %8 = vector.load %arg8[%c0_8, %c0_9] : memref<1x128xf32, #tpu.memory_space<vmem>>, vector<1x128xf32>
    %9 = vector.broadcast %8 : vector<1x128xf32> to vector<32x128xf32>
    %10 = arith.addf %7, %9 : vector<32x128xf32>
    %cst_10 = arith.constant 0.000000e+00 : f32
    %11 = vector.broadcast %cst_10 : f32 to vector<32x128xf32>
    %12 = arith.maximumf %10, %11 : vector<32x128xf32>
    %13 = arith.truncf %12 : vector<32x128xf32> to vector<32x128xbf16>
    %c0_11 = arith.constant 0 : index
    %c0_12 = arith.constant 0 : index
    %14 = vector.load %arg7[%c0_11, %c0_12] : memref<128x128xbf16, #tpu.memory_space<vmem>>, vector<128x128xbf16>
    %cst_13 = arith.constant dense<0.000000e+00> : vector<32x128xf32>
    %15 = tpu.matmul %13, %14, %cst_13 {dimension_numbers = #tpu.dot_dimension_numbers<[1], [0], [0], [1], [0, 0, 1, 1], [], []>} : vector<32x128xbf16>, vector<128x128xbf16>, vector<32x128xf32> -> vector<32x128xf32>
    %16 = arith.truncf %15 : vector<32x128xf32> to vector<32x128xbf16>
    %cst_14 = arith.constant dense<0.000000e+00> : vector<32x128xf32>
    %17 = tpu.matmul %1, %16, %cst_14 {dimension_numbers = #tpu.dot_dimension_numbers<[1], [0], [0], [1], [0, 0, 1, 1], [], []>} : vector<32x32xbf16>, vector<32x128xbf16>, vector<32x128xf32> -> vector<32x128xf32>
    %c0_15 = arith.constant 0 : index
    %c0_16 = arith.constant 0 : index
    %18 = vector.load %arg9[%c0_15, %c0_16] : memref<1x128xf32, #tpu.memory_space<vmem>>, vector<1x128xf32>
    %19 = vector.broadcast %18 : vector<1x128xf32> to vector<32x128xf32>
    %20 = arith.addf %17, %19 : vector<32x128xf32>
    %cst_17 = arith.constant 0.000000e+00 : f32
    %21 = vector.broadcast %cst_17 : f32 to vector<32x128xf32>
    %22 = arith.maximumf %20, %21 : vector<32x128xf32>
    %c0_18 = arith.constant 0 : index
    %c0_19 = arith.constant 0 : index
    %23 = vector.load %arg23[%c0_18, %c0_19] : memref<32x128xf32, #tpu.memory_space<vmem>>, vector<32x128xf32>
    tpu.vector_store %arg23[%c0_18, %c0_19], %22 {strides = array<i32>} : memref<32x128xf32, #tpu.memory_space<vmem>>, vector<32x128xf32>,
    %cst_20 = arith.constant 0.000000e+00 : f32
    %24 = vector.broadcast %cst_20 : f32 to vector<8x128xf32>
    %c0_21 = arith.constant 0 : index
    %c0_22 = arith.constant 0 : index
    %25 = vector.load %arg24[%c0_21, %c0_22] : memref<8x128xf32, #tpu.memory_space<vmem>>, vector<8x128xf32>
    tpu.vector_store %arg24[%c0_21, %c0_22], %24 {strides = array<i32>} : memref<8x128xf32, #tpu.memory_space<vmem>>, vector<8x128xf32>,
    %cst_23 = arith.constant 0.000000e+00 : f32
    %26 = vector.broadcast %cst_23 : f32 to vector<8x128xf32>
    %c0_24 = arith.constant 0 : index
    %c0_25 = arith.constant 0 : index
    %27 = vector.load %arg25[%c0_24, %c0_25] : memref<8x128xf32, #tpu.memory_space<vmem>>, vector<8x128xf32>
    tpu.vector_store %arg25[%c0_24, %c0_25], %26 {strides = array<i32>} : memref<8x128xf32, #tpu.memory_space<vmem>>, vector<8x128xf32>,
    %c2_i32 = arith.constant 2 : i32
    %28 = arith.muli %arg0, %c2_i32 : i32
    %c0_i32 = arith.constant 0 : i32
    %29 = arith.addi %28, %c0_i32 : i32
    %30 = arith.index_cast %29 : i32 to index
    %31 = memref.load %arg1[%30] : memref<4xi32, #tpu.memory_space<smem>>
    %c2_i32_26 = arith.constant 2 : i32
    %32 = arith.muli %arg0, %c2_i32_26 : i32
    %c0_i32_27 = arith.constant 0 : i32
    %33 = arith.addi %32, %c0_i32_27 : i32
    %34 = arith.index_cast %33 : i32 to index
    %35 = memref.load %arg2[%34] : memref<4xi32, #tpu.memory_space<smem>>
    %36 = arith.index_cast %31 : i32 to index
    %c0_28 = arith.constant 0 : index
    %37 = vector.load %arg23[%36, %c0_28] : memref<32x128xf32, #tpu.memory_space<vmem>>, vector<1x128xf32>
    %c0_29 = arith.constant 0 : index
    %c0_30 = arith.constant 0 : index
    %38 = vector.load %arg24[%c0_29, %c0_30] : memref<8x128xf32, #tpu.memory_space<vmem>>, vector<1x128xf32>
    tpu.vector_store %arg24[%c0_29, %c0_30], %37 {strides = array<i32>} : memref<8x128xf32, #tpu.memory_space<vmem>>, vector<1x128xf32>,
    %39 = arith.index_cast %35 : i32 to index
    %c0_31 = arith.constant 0 : index
    %40 = vector.load %arg23[%39, %c0_31] : memref<32x128xf32, #tpu.memory_space<vmem>>, vector<1x128xf32>
    %c0_32 = arith.constant 0 : index
    %c0_33 = arith.constant 0 : index
    %41 = vector.load %arg25[%c0_32, %c0_33] : memref<8x128xf32, #tpu.memory_space<vmem>>, vector<1x128xf32>
    tpu.vector_store %arg25[%c0_32, %c0_33], %40 {strides = array<i32>} : memref<8x128xf32, #tpu.memory_space<vmem>>, vector<1x128xf32>,
    %c2_i32_34 = arith.constant 2 : i32
    %42 = arith.muli %arg0, %c2_i32_34 : i32
    %c1_i32 = arith.constant 1 : i32
    %43 = arith.addi %42, %c1_i32 : i32
    %44 = arith.index_cast %43 : i32 to index
    %45 = memref.load %arg1[%44] : memref<4xi32, #tpu.memory_space<smem>>
    %c2_i32_35 = arith.constant 2 : i32
    %46 = arith.muli %arg0, %c2_i32_35 : i32
    %c1_i32_36 = arith.constant 1 : i32
    %47 = arith.addi %46, %c1_i32_36 : i32
    %48 = arith.index_cast %47 : i32 to index
    %49 = memref.load %arg2[%48] : memref<4xi32, #tpu.memory_space<smem>>
    %50 = arith.index_cast %45 : i32 to index
    %c0_37 = arith.constant 0 : index
    %51 = vector.load %arg23[%50, %c0_37] : memref<32x128xf32, #tpu.memory_space<vmem>>, vector<1x128xf32>
    %c1 = arith.constant 1 : index
    %c0_38 = arith.constant 0 : index
    %52 = vector.load %arg24[%c1, %c0_38] : memref<8x128xf32, #tpu.memory_space<vmem>>, vector<1x128xf32>
    tpu.vector_store %arg24[%c1, %c0_38], %51 {strides = array<i32>} : memref<8x128xf32, #tpu.memory_space<vmem>>, vector<1x128xf32>,
    %53 = arith.index_cast %49 : i32 to index
    %c0_39 = arith.constant 0 : index
    %54 = vector.load %arg23[%53, %c0_39] : memref<32x128xf32, #tpu.memory_space<vmem>>, vector<1x128xf32>
    %c1_40 = arith.constant 1 : index
    %c0_41 = arith.constant 0 : index
    %55 = vector.load %arg25[%c1_40, %c0_41] : memref<8x128xf32, #tpu.memory_space<vmem>>, vector<1x128xf32>
    tpu.vector_store %arg25[%c1_40, %c0_41], %54 {strides = array<i32>} : memref<8x128xf32, #tpu.memory_space<vmem>>, vector<1x128xf32>,
    %c0_42 = arith.constant 0 : index
    %c0_43 = arith.constant 0 : index
    %56 = vector.load %arg24[%c0_42, %c0_43] : memref<8x128xf32, #tpu.memory_space<vmem>>, vector<8x128xf32>
    %57 = arith.truncf %56 : vector<8x128xf32> to vector<8x128xbf16>
    %c0_44 = arith.constant 0 : index
    %c0_45 = arith.constant 0 : index
    %58 = vector.load %arg25[%c0_44, %c0_45] : memref<8x128xf32, #tpu.memory_space<vmem>>, vector<8x128xf32>
    %59 = arith.truncf %58 : vector<8x128xf32> to vector<8x128xbf16>
    %c0_46 = arith.constant 0 : index
    %c0_47 = arith.constant 0 : index
    %c0_48 = arith.constant 0 : index
    %60 = vector.load %arg5[%c0_46, %c0_47, %c0_48] : memref<1x8x128xbf16, #tpu.memory_space<vmem>>, vector<1x8x128xbf16>
    %61 = vector.shape_cast %60 : vector<1x8x128xbf16> to vector<8x128xbf16>
    %c0_49 = arith.constant 0 : index
    %c0_50 = arith.constant 0 : index
    %62 = vector.load %arg10[%c0_49, %c0_50] : memref<128x128xbf16, #tpu.memory_space<vmem>>, vector<128x128xbf16>
    %cst_51 = arith.constant dense<0.000000e+00> : vector<8x128xf32>
    %63 = tpu.matmul %61, %62, %cst_51 {dimension_numbers = #tpu.dot_dimension_numbers<[1], [0], [0], [1], [0, 0, 1, 1], [], []>} : vector<8x128xbf16>, vector<128x128xbf16>, vector<8x128xf32> -> vector<8x128xf32>
    %c0_52 = arith.constant 0 : index
    %c0_53 = arith.constant 0 : index
    %64 = vector.load %arg11[%c0_52, %c0_53] : memref<1x128xf32, #tpu.memory_space<vmem>>, vector<1x128xf32>
    %65 = vector.broadcast %64 : vector<1x128xf32> to vector<8x128xf32>
    %66 = arith.addf %63, %65 : vector<8x128xf32>
    %cst_54 = arith.constant 0.000000e+00 : f32
    %67 = vector.broadcast %cst_54 : f32 to vector<8x128xf32>
    %68 = arith.maximumf %66, %67 : vector<8x128xf32>
    %c0_55 = arith.constant 0 : index
    %c0_56 = arith.constant 0 : index
    %69 = vector.load %arg12[%c0_55, %c0_56] : memref<128x128xbf16, #tpu.memory_space<vmem>>, vector<128x128xbf16>
    %cst_57 = arith.constant dense<0.000000e+00> : vector<8x128xf32>
    %70 = tpu.matmul %57, %69, %cst_57 {dimension_numbers = #tpu.dot_dimension_numbers<[1], [0], [0], [1], [0, 0, 1, 1], [], []>} : vector<8x128xbf16>, vector<128x128xbf16>, vector<8x128xf32> -> vector<8x128xf32>
    %c0_58 = arith.constant 0 : index
    %c0_59 = arith.constant 0 : index
    %71 = vector.load %arg13[%c0_58, %c0_59] : memref<128x128xbf16, #tpu.memory_space<vmem>>, vector<128x128xbf16>
    %cst_60 = arith.constant dense<0.000000e+00> : vector<8x128xf32>
    %72 = tpu.matmul %59, %71, %cst_60 {dimension_numbers = #tpu.dot_dimension_numbers<[1], [0], [0], [1], [0, 0, 1, 1], [], []>} : vector<8x128xbf16>, vector<128x128xbf16>, vector<8x128xf32> -> vector<8x128xf32>
    %73 = arith.addf %70, %72 : vector<8x128xf32>
    %74 = arith.truncf %68 : vector<8x128xf32> to vector<8x128xbf16>
    %c0_61 = arith.constant 0 : index
    %c0_62 = arith.constant 0 : index
    %75 = vector.load %arg14[%c0_61, %c0_62] : memref<128x128xbf16, #tpu.memory_space<vmem>>, vector<128x128xbf16>
    %cst_63 = arith.constant dense<0.000000e+00> : vector<8x128xf32>
    %76 = tpu.matmul %74, %75, %cst_63 {dimension_numbers = #tpu.dot_dimension_numbers<[1], [0], [0], [1], [0, 0, 1, 1], [], []>} : vector<8x128xbf16>, vector<128x128xbf16>, vector<8x128xf32> -> vector<8x128xf32>
    %77 = arith.addf %73, %76 : vector<8x128xf32>
    %c0_64 = arith.constant 0 : index
    %c0_65 = arith.constant 0 : index
    %78 = vector.load %arg15[%c0_64, %c0_65] : memref<1x128xf32, #tpu.memory_space<vmem>>, vector<1x128xf32>
    %79 = vector.broadcast %78 : vector<1x128xf32> to vector<8x128xf32>
    %80 = arith.mulf %77, %79 : vector<8x128xf32>
    %c0_66 = arith.constant 0 : index
    %c0_67 = arith.constant 0 : index
    %81 = vector.load %arg16[%c0_66, %c0_67] : memref<1x128xf32, #tpu.memory_space<vmem>>, vector<1x128xf32>
    %82 = vector.broadcast %81 : vector<1x128xf32> to vector<8x128xf32>
    %83 = arith.addf %80, %82 : vector<8x128xf32>
    %cst_68 = arith.constant 0.000000e+00 : f32
    %84 = vector.broadcast %cst_68 : f32 to vector<8x128xf32>
    %85 = arith.maximumf %83, %84 : vector<8x128xf32>
    %86 = arith.truncf %85 : vector<8x128xf32> to vector<8x128xbf16>
    %c0_69 = arith.constant 0 : index
    %c0_70 = arith.constant 0 : index
    %87 = vector.load %arg17[%c0_69, %c0_70] : memref<128x128xbf16, #tpu.memory_space<vmem>>, vector<128x128xbf16>
    %cst_71 = arith.constant dense<0.000000e+00> : vector<8x128xf32>
    %88 = tpu.matmul %86, %87, %cst_71 {dimension_numbers = #tpu.dot_dimension_numbers<[1], [0], [0], [1], [0, 0, 1, 1], [], []>} : vector<8x128xbf16>, vector<128x128xbf16>, vector<8x128xf32> -> vector<8x128xf32>
    %c0_72 = arith.constant 0 : index
    %c0_73 = arith.constant 0 : index
    %89 = vector.load %arg18[%c0_72, %c0_73] : memref<1x128xf32, #tpu.memory_space<vmem>>, vector<1x128xf32>
    %90 = vector.broadcast %89 : vector<1x128xf32> to vector<8x128xf32>
    %91 = arith.mulf %88, %90 : vector<8x128xf32>
    %c0_74 = arith.constant 0 : index
    %c0_75 = arith.constant 0 : index
    %92 = vector.load %arg19[%c0_74, %c0_75] : memref<1x128xf32, #tpu.memory_space<vmem>>, vector<1x128xf32>
    %93 = vector.broadcast %92 : vector<1x128xf32> to vector<8x128xf32>
    %94 = arith.addf %91, %93 : vector<8x128xf32>
    %cst_76 = arith.constant 0.000000e+00 : f32
    %95 = vector.broadcast %cst_76 : f32 to vector<8x128xf32>
    %96 = arith.maximumf %94, %95 : vector<8x128xf32>
    %97 = arith.truncf %96 : vector<8x128xf32> to vector<8x128xbf16>
    %c0_77 = arith.constant 0 : index
    %c0_78 = arith.constant 0 : index
    %98 = vector.load %arg20[%c0_77, %c0_78] : memref<128x128xbf16, #tpu.memory_space<vmem>>, vector<128x128xbf16>
    %cst_79 = arith.constant dense<0.000000e+00> : vector<8x128xf32>
    %99 = tpu.matmul %97, %98, %cst_79 {dimension_numbers = #tpu.dot_dimension_numbers<[1], [0], [0], [1], [0, 0, 1, 1], [], []>} : vector<8x128xbf16>, vector<128x128xbf16>, vector<8x128xf32> -> vector<8x128xf32>
    %c0_80 = arith.constant 0 : index
    %c0_81 = arith.constant 0 : index
    %100 = vector.load %arg21[%c0_80, %c0_81] : memref<1x128xf32, #tpu.memory_space<vmem>>, vector<1x128xf32>
    %101 = vector.broadcast %100 : vector<1x128xf32> to vector<8x128xf32>
    %102 = arith.addf %99, %101 : vector<8x128xf32>
    %c0_82 = arith.constant 0 : index
    %c0_83 = arith.constant 0 : index
    %c0_84 = arith.constant 0 : index
    %103 = vector.load %arg22[%c0_82, %c0_83, %c0_84] : memref<1x8x128xf32, #tpu.memory_space<vmem>>, vector<1x8x128xf32>
    %104 = vector.shape_cast %103 : vector<1x8x128xf32> to vector<8x128xf32>
    %105 = vector.shape_cast %102 : vector<8x128xf32> to vector<1x8x128xf32>
    tpu.vector_store %arg22[%c0_82, %c0_83, %c0_84], %105 {strides = array<i32>} : memref<1x8x128xf32, #tpu.memory_space<vmem>>, vector<1x8x128xf32>,
    return
  }
  func.func @transform_0(%arg0: i32, %arg1: memref<4xi32, #tpu.memory_space<smem>>, %arg2: memref<4xi32, #tpu.memory_space<smem>>) -> (i32, i32, i32) {
    %c0_i32 = arith.constant 0 : i32
    %c0_i32_0 = arith.constant 0 : i32
    %c0_i32_1 = arith.constant 0 : i32
    return %arg0, %c0_i32, %c0_i32_0 : i32, i32, i32
  }
  func.func @transform_1(%arg0: i32, %arg1: memref<4xi32, #tpu.memory_space<smem>>, %arg2: memref<4xi32, #tpu.memory_space<smem>>) -> (i32, i32, i32) {
    %c0_i32 = arith.constant 0 : i32
    %c0_i32_0 = arith.constant 0 : i32
    %c0_i32_1 = arith.constant 0 : i32
    return %arg0, %c0_i32, %c0_i32_0 : i32, i32, i32
  }
  func.func @transform_2(%arg0: i32, %arg1: memref<4xi32, #tpu.memory_space<smem>>, %arg2: memref<4xi32, #tpu.memory_space<smem>>) -> (i32, i32, i32) {
    %c0_i32 = arith.constant 0 : i32
    %c0_i32_0 = arith.constant 0 : i32
    %c0_i32_1 = arith.constant 0 : i32
    return %arg0, %c0_i32, %c0_i32_0 : i32, i32, i32
  }
  func.func @transform_3(%arg0: i32, %arg1: memref<4xi32, #tpu.memory_space<smem>>, %arg2: memref<4xi32, #tpu.memory_space<smem>>) -> (i32, i32) {
    %c0_i32 = arith.constant 0 : i32
    %c0_i32_0 = arith.constant 0 : i32
    %c0_i32_1 = arith.constant 0 : i32
    return %c0_i32, %c0_i32_0 : i32, i32
  }
  func.func @transform_4(%arg0: i32, %arg1: memref<4xi32, #tpu.memory_space<smem>>, %arg2: memref<4xi32, #tpu.memory_space<smem>>) -> (i32, i32) {
    %c0_i32 = arith.constant 0 : i32
    %c0_i32_0 = arith.constant 0 : i32
    %c0_i32_1 = arith.constant 0 : i32
    return %c0_i32, %c0_i32_0 : i32, i32
  }
  func.func @transform_5(%arg0: i32, %arg1: memref<4xi32, #tpu.memory_space<smem>>, %arg2: memref<4xi32, #tpu.memory_space<smem>>) -> (i32, i32) {
    %c0_i32 = arith.constant 0 : i32
    %c0_i32_0 = arith.constant 0 : i32
    %c0_i32_1 = arith.constant 0 : i32
    return %c0_i32, %c0_i32_0 : i32, i32
  }
  func.func @transform_6(%arg0: i32, %arg1: memref<4xi32, #tpu.memory_space<smem>>, %arg2: memref<4xi32, #tpu.memory_space<smem>>) -> (i32, i32) {
    %c0_i32 = arith.constant 0 : i32
    %c0_i32_0 = arith.constant 0 : i32
    %c0_i32_1 = arith.constant 0 : i32
    return %c0_i32, %c0_i32_0 : i32, i32
  }
  func.func @transform_7(%arg0: i32, %arg1: memref<4xi32, #tpu.memory_space<smem>>, %arg2: memref<4xi32, #tpu.memory_space<smem>>) -> (i32, i32) {
    %c0_i32 = arith.constant 0 : i32
    %c0_i32_0 = arith.constant 0 : i32
    %c0_i32_1 = arith.constant 0 : i32
    return %c0_i32, %c0_i32_0 : i32, i32
  }
  func.func @transform_8(%arg0: i32, %arg1: memref<4xi32, #tpu.memory_space<smem>>, %arg2: memref<4xi32, #tpu.memory_space<smem>>) -> (i32, i32) {
    %c0_i32 = arith.constant 0 : i32
    %c0_i32_0 = arith.constant 0 : i32
    %c0_i32_1 = arith.constant 0 : i32
    return %c0_i32, %c0_i32_0 : i32, i32
  }
  func.func @transform_9(%arg0: i32, %arg1: memref<4xi32, #tpu.memory_space<smem>>, %arg2: memref<4xi32, #tpu.memory_space<smem>>) -> (i32, i32) {
    %c0_i32 = arith.constant 0 : i32
    %c0_i32_0 = arith.constant 0 : i32
    %c0_i32_1 = arith.constant 0 : i32
    return %c0_i32, %c0_i32_0 : i32, i32
  }
  func.func @transform_10(%arg0: i32, %arg1: memref<4xi32, #tpu.memory_space<smem>>, %arg2: memref<4xi32, #tpu.memory_space<smem>>) -> (i32, i32) {
    %c0_i32 = arith.constant 0 : i32
    %c0_i32_0 = arith.constant 0 : i32
    %c0_i32_1 = arith.constant 0 : i32
    return %c0_i32, %c0_i32_0 : i32, i32
  }
  func.func @transform_11(%arg0: i32, %arg1: memref<4xi32, #tpu.memory_space<smem>>, %arg2: memref<4xi32, #tpu.memory_space<smem>>) -> (i32, i32) {
    %c0_i32 = arith.constant 0 : i32
    %c0_i32_0 = arith.constant 0 : i32
    %c0_i32_1 = arith.constant 0 : i32
    return %c0_i32, %c0_i32_0 : i32, i32
  }
  func.func @transform_12(%arg0: i32, %arg1: memref<4xi32, #tpu.memory_space<smem>>, %arg2: memref<4xi32, #tpu.memory_space<smem>>) -> (i32, i32) {
    %c0_i32 = arith.constant 0 : i32
    %c0_i32_0 = arith.constant 0 : i32
    %c0_i32_1 = arith.constant 0 : i32
    return %c0_i32, %c0_i32_0 : i32, i32
  }
  func.func @transform_13(%arg0: i32, %arg1: memref<4xi32, #tpu.memory_space<smem>>, %arg2: memref<4xi32, #tpu.memory_space<smem>>) -> (i32, i32) {
    %c0_i32 = arith.constant 0 : i32
    %c0_i32_0 = arith.constant 0 : i32
    %c0_i32_1 = arith.constant 0 : i32
    return %c0_i32, %c0_i32_0 : i32, i32
  }
  func.func @transform_14(%arg0: i32, %arg1: memref<4xi32, #tpu.memory_space<smem>>, %arg2: memref<4xi32, #tpu.memory_space<smem>>) -> (i32, i32) {
    %c0_i32 = arith.constant 0 : i32
    %c0_i32_0 = arith.constant 0 : i32
    %c0_i32_1 = arith.constant 0 : i32
    return %c0_i32, %c0_i32_0 : i32, i32
  }
  func.func @transform_15(%arg0: i32, %arg1: memref<4xi32, #tpu.memory_space<smem>>, %arg2: memref<4xi32, #tpu.memory_space<smem>>) -> (i32, i32) {
    %c0_i32 = arith.constant 0 : i32
    %c0_i32_0 = arith.constant 0 : i32
    %c0_i32_1 = arith.constant 0 : i32
    return %c0_i32, %c0_i32_0 : i32, i32
  }
  func.func @transform_16(%arg0: i32, %arg1: memref<4xi32, #tpu.memory_space<smem>>, %arg2: memref<4xi32, #tpu.memory_space<smem>>) -> (i32, i32) {
    %c0_i32 = arith.constant 0 : i32
    %c0_i32_0 = arith.constant 0 : i32
    %c0_i32_1 = arith.constant 0 : i32
    return %c0_i32, %c0_i32_0 : i32, i32
  }
  func.func @transform_17(%arg0: i32, %arg1: memref<4xi32, #tpu.memory_space<smem>>, %arg2: memref<4xi32, #tpu.memory_space<smem>>) -> (i32, i32) {
    %c0_i32 = arith.constant 0 : i32
    %c0_i32_0 = arith.constant 0 : i32
    %c0_i32_1 = arith.constant 0 : i32
    return %c0_i32, %c0_i32_0 : i32, i32
  }
  func.func @transform_18(%arg0: i32, %arg1: memref<4xi32, #tpu.memory_space<smem>>, %arg2: memref<4xi32, #tpu.memory_space<smem>>) -> (i32, i32) {
    %c0_i32 = arith.constant 0 : i32
    %c0_i32_0 = arith.constant 0 : i32
    %c0_i32_1 = arith.constant 0 : i32
    return %c0_i32, %c0_i32_0 : i32, i32
  }
  func.func @transform_19(%arg0: i32, %arg1: memref<4xi32, #tpu.memory_space<smem>>, %arg2: memref<4xi32, #tpu.memory_space<smem>>) -> (i32, i32, i32) {
    %c0_i32 = arith.constant 0 : i32
    %c0_i32_0 = arith.constant 0 : i32
    %c0_i32_1 = arith.constant 0 : i32
    return %arg0, %c0_i32, %c0_i32_0 : i32, i32, i32
  }
}

</mosaic_0001>

<bundles_post_ra>
// kernel: tpu_custom_call.1
= control target key start
LH: loop header
LB: loop body
LE: loop exit
PB: predicated region body
PF: predicated region fallthrough
CT: control target
= control target key end

     0   :  { %s3881_s0 = inlined_call_operand.hbm [shape: s32[4], index: 0, kind: input, shape index: {}]   ;;  %s3882_s2 = inlined_call_operand.hbm [shape: bf16[2,32,128], index: 2, kind: input, shape index: {}]   ;;  %s3883_s3 = inlined_call_operand.hbm [shape: bf16[2,32,32], index: 3, kind: input, shape index: {}]   ;;  %s3884_s4 = inlined_call_operand.hbm [shape: bf16[2,8,128], index: 4, kind: input, shape index: {}]   ;;  %s3885_s5 = inlined_call_operand.hbm [shape: bf16[128,128], index: 5, kind: input, shape index: {}]   ;;  %s3886_s6 = inlined_call_operand.hbm [shape: bf16[128,128], index: 6, kind: input, shape index: {}]   ;;  %s3887_s7 = inlined_call_operand.vmem [shape: f32[1,128], index: 7, kind: input, shape index: {}]   ;;  %s3888_s8 = inlined_call_operand.vmem [shape: f32[1,128], index: 8, kind: input, shape index: {}]   ;;  %s3889_s9 = inlined_call_operand.hbm [shape: bf16[128,128], index: 9, kind: input, shape index: {}]   ;;  %s3890_s10 = inlined_call_operand.vmem [shape: f32[1,128], index: 10, kind: input, shape index: {}]   ;;  %s3891_s11 = inlined_call_operand.hbm [shape: bf16[128,128], index: 11, kind: input, shape index: {}]   ;;  %s3892_s12 = inlined_call_operand.hbm [shape: bf16[128,128], index: 12, kind: input, shape index: {}]   ;;  %s3893_s13 = inlined_call_operand.hbm [shape: bf16[128,128], index: 13, kind: input, shape index: {}]   ;;  %s3894_s14 = inlined_call_operand.vmem [shape: f32[1,128], index: 14, kind: input, shape index: {}]   ;;  %s3895_s15 = inlined_call_operand.vmem [shape: f32[1,128], index: 15, kind: input, shape index: {}]   ;;  %s3896_s16 = inlined_call_operand.hbm [shape: bf16[128,128], index: 16, kind: input, shape index: {}]   ;;  %s3897_s17 = inlined_call_operand.vmem [shape: f32[1,128], index: 17, kind: input, shape index: {}]   ;;  %s3898_s18 = inlined_call_operand.hbm [shape: f32[1,128], index: 18, kind: input, shape index: {}]   ;;  %s3899_s19 = inlined_call_operand.vmem [shape: bf16[128,128], index: 19, kind: input, shape index: {}]   ;;  %s3900_s20 = inlined_call_operand.vmem [shape: f32[1,128], index: 20, kind: input, shape index: {}]   ;;  %s3901_s21 = inlined_call_operand.hbm [shape: f32[2,8,128], index: 21, kind: output, shape index: {}]   ;;  %s3902_s1 = inlined_call_operand.vmem [shape: s32[4], index: 1, kind: input, shape index: {}]  }
   0x1   :  { %3938 = sst [smem:[#allocation41_spill]] %s3881_s0 }
   0x2   :  { %3939 = sst [smem:[#allocation42_spill]] %s3882_s2  ;;  %s3955_s26 = sld [smem:[#allocation41_spill]] }
   0x3   :  { %3940 = sst [smem:[#allocation43_spill]] %s3883_s3 }
   0x4   :  { %3941 = sst [smem:[#allocation44_spill]] %s3884_s4 }
   0x5   :  { %3942 = sst [smem:[#allocation45_spill]] %s3885_s5 }
   0x6   :  { %3943 = sst [smem:[#allocation46_spill]] %s3886_s6 }
   0x7   :  { %3944 = sst [smem:[#allocation47_spill]] %s3888_s8 }
   0x8   :  { %3945 = sst [smem:[#allocation48_spill]] %s3889_s9 }
   0x9   :  { %3946 = sst [smem:[#allocation49_spill]] %s3890_s10 }
   0xa   :  { %3947 = sst [smem:[#allocation50_spill]] %s3892_s12 }
   0xb   :  { %3948 = sst [smem:[#allocation51_spill]] %s3894_s14 }
   0xc   :  { %3949 = sst [smem:[#allocation52_spill]] %s3895_s15  ;;  %s2719_s15 = scalar_lea.hbm %s3955_s26, 16 }
   0xd   :  { %3950 = sst [smem:[#allocation53_spill]] %s3896_s16  ;;  %p2720_p0 = scmp.ne.s32.totalorder %s3955_s26, %s2719_s15 }
   0xe   :  { %3951 = sst [smem:[#allocation54_spill]] %s3897_s17  ;;  %p2723_p1 = scmp.lt.u32.totalorder %s2719_s15, %s3955_s26 }
   0xf   :  { %3952 = sst [smem:[#allocation55_spill]] %s3899_s19 }
  0x10   :  { %3953 = sst [smem:[#allocation56_spill]] %s3900_s20  ;;  %p2725_p2 = pnand %p2723_p1, %p2720_p0 }
  0x11   :  { %3954 = sst [smem:[#allocation57_spill]] %s3901_s21 }
  0x12   :  { %2728 = shalt.err (!%p2725_p2)  }
  0x13   :  { %s3145_s0 = smov [#allocation6]   ;;  %s28_s23 = sshll.u32 %s3902_s1, 4  ;;  %s29_s23 = int_to_ptr.vmem [resolvable:$true] %s28_s23 }
  0x14   :  { %27 = dma.hbm_to_smem %s3955_s26, 16, %s3145_s0, [#allocation5] }
  0x15   :  { %s2729_s2 = scalar_lea.vmem %s29_s23, 16  ;;  %p2734_p4 = scmp.lt.s32.totalorder %s29_s23, %s29_s23 }
  0x16   :  { %p2730_p3 = scmp.ne.s32.totalorder %s29_s23, %s2729_s2  ;;  %p2735_p5 = scmp.lt.s32.totalorder %s2729_s2, %s2729_s2 }
  0x18   :  { %p2736_p6 = por %p2735_p5, %p2734_p4 }
  0x1a   :  { %p2737_p7 = pnand %p2736_p6, %p2730_p3 }
  0x1c   :  { %2740 = shalt.err (!%p2737_p7)  }
  0x1d   :  { %s3146_s15 = smov [#allocation7]  }
  0x1e   :  { %31 = dma.vmem_to_smem %s29_s23, 16, %s3146_s15, [#allocation5] }
  0x1f   :  { %3099 = dma.done.wait [#allocation5], 32 }
  0x20   :  { %3100 = vsyncadd [#allocation5], 4294967264 }
  0x21   :  { %33 = sfence }
  0x22   :  { %34 = vsyncpa [#allocation9], 0 }
  0x23   :  { %36 = vsyncpa [#allocation9 + $0x1], 0 }
  0x24   :  { %37 = vsyncpa [#allocation12], 0 }
  0x25   :  { %39 = vsyncpa [#allocation12 + $0x1], 0 }
  0x26   :  { %40 = vsyncpa [#allocation15], 0 }
  0x27   :  { %41 = vsyncpa [#allocation18], 0 }
  0x28   :  { %42 = vsyncpa [#allocation21], 0 }
  0x29   :  { %43 = vsyncpa [#allocation24], 0 }
  0x2a   :  { %44 = vsyncpa [#allocation10], 0 }
  0x2b   :  { %46 = vsyncpa [#allocation10 + $0x1], 0  ;;  %s3288_s1 = smov 0   ;;  %s3290_s24 = smov 0  }
  0x2c   :  { %s3292_s3 = smov 0   ;;  %s3294_s25 = smov 0  }
  0x2d LB: > { %3956 = sst [smem:[#allocation35_spill]] %s3131_s1  ;;  %s3147_s26 = smov [#allocation14]   ;;  %s3143_s25 = sphi %s3294_s25, %s4013_s25   ;;  %s3139_s3 = sphi %s3292_s3, %s4015_s3   ;;  %s3135_s24 = sphi %s3290_s24, %s4017_s24   ;;  %s3131_s1 = sphi %s3288_s1, %s4016_s1  }
  0x2e   : > { %3957 = sst [smem:[#allocation36_spill]] %s3139_s3  ;;  %s509_s27 = sshll.u32 %s3147_s26, 4  ;;  %s3314_s27 = int_to_ptr.vmem [resolvable:$true] %s509_s27 }
  0x2f   : > { %s3309_s4 = sadd.s32 4294967295, %s3143_s25   ;;  %p2124_p8 = scmp.ge.s32.totalorder %s3143_s25, 1 }
  0x30   : > { %p3911_p9 = scmp.eq.s32.totalorder %s3309_s4, 0  ;;  %p497_p10 = scmp.lt.s32.totalorder %s3143_s25, 3 }
  0x31   : > { %s3148_s29 = smov [#allocation17]   ;;  %s3149_s30 = smov [#allocation20]  }
  0x32   : > { %p3316_p11 = pnand %p2124_p8, %p497_p10  ;;  %s541_s0 = sshll.u32 %s3148_s29, 4  ;;  %s3329_s0 = int_to_ptr.vmem [resolvable:$true] %s541_s0 }
  0x33   : > { %s570_s6 = sshll.u32 %s3149_s30, 4  ;;  %s3960_s2 = sld [smem:[#allocation45_spill]]  ;;  %s3331_s6 = int_to_ptr.vmem [resolvable:$true] %s570_s6 }
  0x34   : > { %s3958_s28 = scalar_select %p3316_p11, 1, 0 }
  0x35   : > { %p2548_p13 = pneg %p3316_p11 }
  0x37   : > { %p3325_p0 = pnand %p2548_p13, %p3911_p9 }
  0x39   : > { %s3959_s5 = scalar_select %p3325_p0, 1, 0 }
  0x3a   : > { %s2741_s15 = scalar_lea.hbm %s3960_s2, 1024  ;;  %p3341_p2 = pneg %p3325_p0 }
  0x3b   : > { %p2742_p1 = scmp.ne.s32.totalorder %s3960_s2, %s2741_s15  ;;  %p2748_p5 = scmp.lt.u32.totalorder %s2741_s15, %s3960_s2 }
  0x3c   : > { %s3961_s29 = scalar_select %p3341_p2, 1, 0 }
  0x3d   : > { %p2744_p3 = pnand %p3341_p2, %p2742_p1 }
  0x3f   : > { %p2745_p4 = pneg %p2744_p3 }
  0x41   : > { %p2750_p6 = pnand %p2748_p5, %p2745_p4 }
  0x43   : > { %2753 = shalt.err (!%p2750_p6)
}
  0x44   : > { %s2754_s21 = scalar_lea.vmem %s3314_s27, 1024  ;;  %p2762_p13 = scmp.lt.s32.totalorder %s3314_s27, %s3314_s27 }
  0x45   : > { %p2755_p7 = scmp.ne.s32.totalorder %s3314_s27, %s2754_s21  ;;  %p2763_p12 = scmp.lt.s32.totalorder %s2754_s21, %s2754_s21 }
  0x47   : > { %p2757_p8 = pnand %p2755_p7, %p3341_p2  ;;  %p2764_p1 = por %p2763_p12, %p2762_p13 }
  0x49   : > { %p2758_p10 = pneg %p2757_p8 }
  0x4b   : > { %p2765_p3 = pnand %p2764_p1, %p2758_p10 }
  0x4d   : > { %2768 = shalt.err (!%p2765_p3)
}
  0x4e   : > { %s3913_s22 = smov 64   ;;  %s3915_s20 = smov 4  }
  0x4f   : > { %2551 = dma.hbm_to_vmem [thread:$0]  (!%p3325_p0), %s3960_s2, 1024, %s3314_s27, [#allocation15], %s3913_s22, %s3913_s22, %s3915_s20  }
  0x50   : > { %s3962_s9 = sld [smem:[#allocation48_spill]] }
  0x56   : > { %s2769_s21 = scalar_lea.hbm %s3962_s9, 1024 }
  0x57   : > { %p2770_p12 = scmp.ne.s32.totalorder %s3962_s9, %s2769_s21  ;;  %p2776_p6 = scmp.lt.u32.totalorder %s2769_s21, %s3962_s9 }
  0x59   : > { %p2772_p4 = pnand %p2770_p12, %p3341_p2 }
  0x5b   : > { %p2773_p5 = pneg %p2772_p4 }
  0x5d   : > { %p2778_p7 = pnand %p2776_p6, %p2773_p5 }
  0x5f   : > { %2781 = shalt.err (!%p2778_p7)
}
  0x60   : > { %s2782_s27 = scalar_lea.vmem %s3329_s0, 1024  ;;  %p2790_p1 = scmp.lt.s32.totalorder %s3329_s0, %s3329_s0 }
  0x61   : > { %p2783_p8 = scmp.ne.s32.totalorder %s3329_s0, %s2782_s27  ;;  %p2791_p3 = scmp.lt.s32.totalorder %s2782_s27, %s2782_s27 }
  0x63   : > { %p2785_p10 = pnand %p2783_p8, %p3341_p2  ;;  %p2792_p12 = por %p2791_p3, %p2790_p1 }
  0x65   : > { %p2786_p13 = pneg %p2785_p10 }
  0x67   : > { %p2793_p4 = pnand %p2792_p12, %p2786_p13 }
  0x69   : > { %2796 = shalt.err (!%p2793_p4)
}
  0x6a   : > { %2557 = dma.hbm_to_vmem [thread:$0]  (!%p3325_p0), %s3962_s9, 1024, %s3329_s0, [#allocation18], %s3913_s22, %s3913_s22, %s3915_s20  }
  0x6b   : > { %s3963_s12 = sld [smem:[#allocation50_spill]] }
  0x71   : > { %s2797_s23 = scalar_lea.hbm %s3963_s12, 1024 }
  0x72   : > { %p2798_p5 = scmp.ne.s32.totalorder %s3963_s12, %s2797_s23  ;;  %p2804_p8 = scmp.lt.u32.totalorder %s2797_s23, %s3963_s12 }
  0x74   : > { %p2800_p6 = pnand %p2798_p5, %p3341_p2 }
  0x76   : > { %p2801_p7 = pneg %p2800_p6 }
  0x78   : > { %p2806_p10 = pnand %p2804_p8, %p2801_p7 }
  0x7a   : > { %2809 = shalt.err (!%p2806_p10)
}
  0x7b   : > { %s2810_s0 = scalar_lea.vmem %s3331_s6, 1024  ;;  %p2818_p12 = scmp.lt.s32.totalorder %s3331_s6, %s3331_s6 }
  0x7c   : > { %p2811_p13 = scmp.ne.s32.totalorder %s3331_s6, %s2810_s0  ;;  %p2819_p4 = scmp.lt.s32.totalorder %s2810_s0, %s2810_s0 }
  0x7e   : > { %p2813_p1 = pnand %p2811_p13, %p3341_p2  ;;  %p2820_p5 = por %p2819_p4, %p2818_p12 }
  0x80   : > { %p2814_p3 = pneg %p2813_p1 }
  0x82   : > { %p2821_p6 = pnand %p2820_p5, %p2814_p3 }
  0x84   : > { %2824 = shalt.err (!%p2821_p6)
}
  0x85   : > { %2563 = dma.hbm_to_vmem [thread:$0]  (!%p3325_p0), %s3963_s12, 1024, %s3331_s6, [#allocation21], %s3913_s22, %s3913_s22, %s3915_s20  }
  0x86   : > { %s3152_s14 = smov [#allocation23]   ;;  %s3964_s16 = sld [smem:[#allocation53_spill]] }
  0x87   : > { %s602_s17 = sshll.u32 %s3152_s14, 4  ;;  %s603_s17 = int_to_ptr.vmem [resolvable:$true] %s602_s17 }
  0x8c   : > { %s2825_s15 = scalar_lea.hbm %s3964_s16, 1024 }
  0x8d   : > { %p2826_p7 = scmp.ne.s32.totalorder %s3964_s16, %s2825_s15  ;;  %p2832_p13 = scmp.lt.u32.totalorder %s2825_s15, %s3964_s16 }
  0x8f   : > { %p2828_p8 = pnand %p2826_p7, %p3341_p2 }
  0x91   : > { %p2829_p10 = pneg %p2828_p8 }
  0x93   : > { %p2834_p1 = pnand %p2832_p13, %p2829_p10 }
  0x95   : > { %2837 = shalt.err (!%p2834_p1)
}
  0x96   : > { %s2838_s6 = scalar_lea.vmem %s603_s17, 1024  ;;  %p2846_p5 = scmp.lt.s32.totalorder %s603_s17, %s603_s17 }
  0x97   : > { %p2839_p3 = scmp.ne.s32.totalorder %s603_s17, %s2838_s6  ;;  %p2847_p6 = scmp.lt.s32.totalorder %s2838_s6, %s2838_s6 }
  0x99   : > { %p2841_p12 = pnand %p2839_p3, %p3341_p2  ;;  %p2848_p9 = por %p2847_p6, %p2846_p5 }
  0x9b   : > { %p2842_p4 = pneg %p2841_p12 }
  0x9d   : > { %p2849_p11 = pnand %p2848_p9, %p2842_p4 }
  0x9f   : > { %2852 = shalt.err (!%p2849_p11)
}
  0xa0   : > { %2569 = dma.hbm_to_vmem [thread:$0]  (!%p3325_p0), %s3964_s16, 1024, %s603_s17, [#allocation24], %s3913_s22, %s3913_s22, %s3915_s20  }
  0xa1   : > { %s2123_s14 = sadd.s32 4294967294, %s3143_s25   ;;  %s3440_s19 = sadd.s32 1, %s3143_s25  }
  0xa2   : > { %3965 = sst [smem:[#allocation37_spill]] %s3440_s19  ;;  %s56_s23 = ssub.s32 %s3143_s25, %s3440_s19 }
  0xa3   : > { %s59_s15 = sadd.s32 1, %s3139_s3  ;;  %p57_p9 = scmp.eq.s32.totalorder %s56_s23, 0 }
  0xa4   : > { %p66_p11 = scmp.ne.s32.totalorder %s3139_s3, %s3135_s24  ;;  %p67_p7 = scmp.eq.s32.totalorder %s3143_s25, 0 }
  0xa5   : > { %p72_p8 = scmp.ne.s32.totalorder %s3135_s24, %s3131_s1  ;;  %p3967_p13 = scmp.eq.s32.totalorder %s3309_s4, 0 }
  0xa6   : > { %s3451_s26 = scalar_select %p57_p9, %s3139_s3, %s59_s15  }
  0xa7   : > { %p68_p10 = por %p67_p7, %p66_p11  ;;  %p3455_p1 = por %p3967_p13, %p72_p8 }
  0xa8   : > { %3966 = sst [smem:[#allocation38_spill]] %s3451_s26  ;;  %p484_p3 = scmp.eq.s32.totalorder %s3309_s4, 1 }
  0xa9   : > { %s3968_s30 = scalar_select %p3455_p1, 1, 0 }
  0xaa   : > { %p490_p12 = scmp.eq.s32.totalorder %s2123_s14, 1  ;;  %p2595_p4 = scmp.lt.s32.totalorder %s3143_s25, 2 }
  0xab   : > { %s3462_s17 = sand.u32 1, %s3139_s3   ;;  %p3464_p5 = por %p484_p3, %p66_p11 }
  0xac   : > { %p3468_p6 = por %p490_p12, %p72_p8  ;;  %s3919_s6 = sshll.u32 %s3462_s17, 4 }
  0xad   : > { %s3969_s21 = scalar_select %p3464_p5, 1, 0 }
  0xae   : > { %s3971_s0 = scalar_select %p3468_p6, 1, 0 }
  0xaf   : > { %3970 = sst [smem:[#allocation39_spill]] %s3969_s21  ;;  %s3920_s27 = sshll.u32 %s3143_s25, 8 }
  0xb0   : > { %3972 = sst [smem:[#allocation40_spill]] %s3971_s0  ;;  %p3474_p9 = pnand %p2595_p4, %p68_p10 }
  0xb1   : > { %s657_s14 = sand.u32 1, %s3143_s25   ;;  %s3974_s22 = sld [smem:[#allocation43_spill]] }
  0xb2   : > { %s3973_s10 = scalar_select %p3474_p9, 1, 0 }
  0xb3   : > { %s661_s2 = scalar_lea.vmem [#allocation11], %s3919_s6  ;;  %s3153_s12 = smov [#allocation16]  }
  0xb4   : > { %s668_s9 = sshll.u32 %s661_s2, 4  ;;  %s3490_s16 = sshll.u32 %s3153_s12, 4  ;;  %s3488_s9 = int_to_ptr.vmem [resolvable:$true] %s668_s9  ;;  %s523_s16 = int_to_ptr.vmem [resolvable:$true] %s3490_s16 }
  0xb5   : > { %s3492_s26 = scalar_lea.sflag [#allocation12], %s657_s14  ;;  %p3498_p7 = pneg %p3474_p9 }
  0xb7   : > { %s3484_s20 = scalar_lea.hbm %s3974_s22, %s3920_s27  ;;  %s2858_s6 = scalar_lea.hbm %s3974_s22, 512 }
  0xb8   : > { %s2853_s3 = scalar_lea.hbm %s3484_s20, 256  ;;  %p2859_p13 = scmp.lt.u32.totalorder %s3484_s20, %s3974_s22 }
  0xb9   : > { %p2854_p11 = scmp.ne.s32.totalorder %s3484_s20, %s2853_s3  ;;  %p2860_p3 = scmp.lt.u32.totalorder %s2858_s6, %s2853_s3 }
  0xba   : > { %s3975_s23 = scalar_select %p3498_p7, 1, 0 }
  0xbb   : > { %p2856_p8 = pnand %p3498_p7, %p2854_p11  ;;  %p2861_p12 = por %p2860_p3, %p2859_p13 }
  0xbc   : > { %p2862_p4 = scmp.lt.u32.totalorder %s2853_s3, %s3484_s20 }
  0xbd   : > { %p2857_p10 = pneg %p2856_p8 }
  0xbe   : > { %p2863_p6 = por %p2862_p4, %p2861_p12 }
  0xc0   : > { %p2864_p5 = pnand %p2863_p6, %p2857_p10 }
  0xc2   : > { %2867 = shalt.err (!%p2864_p5)
}
  0xc3   : > { %s2868_s14 = scalar_lea.vmem %s3488_s9, 256  ;;  %s3154_s15 = smov [#allocation11]  }
  0xc4   : > { %p2869_p11 = scmp.ne.s32.totalorder %s3488_s9, %s2868_s14  ;;  %s2873_s2 = sshll.u32 %s3154_s15, 4  ;;  %s2874_s2 = int_to_ptr.vmem [resolvable:$false] %s2873_s2 }
  0xc5   : > { %s2875_s27 = scalar_lea.vmem %s2874_s2, 512  ;;  %p2876_p0 = scmp.lt.s32.totalorder %s3488_s9, %s2874_s2 }
  0xc6   : > { %p2871_p8 = pnand %p2869_p11, %p3498_p7  ;;  %p2877_p2 = scmp.lt.s32.totalorder %s2875_s27, %s2868_s14 }
  0xc8   : > { %p2872_p1 = pneg %p2871_p8  ;;  %p2878_p13 = por %p2877_p2, %p2876_p0 }
  0xca   : > { %p2879_p3 = pnand %p2878_p13, %p2872_p1 }
  0xcc   : > { %2882 = shalt.err (!%p2879_p3)
}
  0xcd   : > { %s3976_s3 = smov 4   ;;  %s3977_s6 = smov 64  }
  0xce   : > { %2579 = dma.hbm_to_vmem [thread:$0]  (!%p3474_p9), %s3484_s20, 256, %s3488_s9, %s3492_s26, %s3977_s6, %s3977_s6, %s3976_s3  }
  0xcf   : > { %s3978_s22 = sld [smem:[#allocation46_spill]]  ;;  %p3979_p2 = scmp.ne.s32.totalorder %s3961_s29, 0 }
  0xd5   : > { %s2883_s2 = scalar_lea.hbm %s3978_s22, 1024 }
  0xd6   : > { %p2884_p0 = scmp.ne.s32.totalorder %s3978_s22, %s2883_s2  ;;  %p2890_p6 = scmp.lt.u32.totalorder %s2883_s2, %s3978_s22 }
  0xd8   : > { %p2886_p1 = pnand %p2884_p0, %p3979_p2 }
  0xda   : > { %p2887_p5 = pneg %p2886_p1 }
  0xdc   : > { %p2892_p10 = pnand %p2890_p6, %p2887_p5 }
  0xde   : > { %2895 = shalt.err (!%p2892_p10)
}
  0xdf   : > { %s2896_s1 = scalar_lea.vmem %s523_s16, 1024  ;;  %p2904_p8 = scmp.lt.s32.totalorder %s523_s16, %s523_s16 }
  0xe0   : > { %p2897_p12 = scmp.ne.s32.totalorder %s523_s16, %s2896_s1  ;;  %p2905_p13 = scmp.lt.s32.totalorder %s2896_s1, %s2896_s1 }
  0xe2   : > { %p2899_p4 = pnand %p2897_p12, %p3979_p2  ;;  %p2906_p3 = por %p2905_p13, %p2904_p8 }
  0xe4   : > { %p2900_p11 = pneg %p2899_p4 }
  0xe6   : > { %p2907_p9 = pnand %p2906_p3, %p2900_p11 }
  0xe8   : > { %2910 = shalt.err (!%p2907_p9)
}
  0xe9   : > { %p3980_p0 = scmp.ne.s32.totalorder %s3959_s5, 0  ;;  %s3155_s19 = smov [#allocation19]  }
  0xea   : > { %s557_s0 = sshll.u32 %s3155_s19, 4  ;;  %s3156_s12 = smov [#allocation22]   ;;  %s558_s0 = int_to_ptr.vmem [resolvable:$true] %s557_s0 }
  0xeb   : > { %2554 = dma.hbm_to_vmem [thread:$0]  (!%p3980_p0), %s3978_s22, 1024, %s523_s16, [#allocation15], %s3977_s6, %s3977_s6, %s3976_s3  }
  0xec   : > { %s583_s15 = sshll.u32 %s3156_s12, 4  ;;  %s2911_s14 = scalar_lea.hbm %s3891_s11, 1024  ;;  %s584_s15 = int_to_ptr.vmem [resolvable:$true] %s583_s15 }
  0xed   : > { %p2912_p9 = scmp.ne.s32.totalorder %s3891_s11, %s2911_s14  ;;  %p2918_p6 = scmp.lt.u32.totalorder %s2911_s14, %s3891_s11 }
  0xef   : > { %p2914_p1 = pnand %p2912_p9, %p3979_p2 }
  0xf1   : > { %p2915_p5 = pneg %p2914_p1 }
  0xf3   : > { %p2920_p10 = pnand %p2918_p6, %p2915_p5 }
  0xf5   : > { %2923 = shalt.err (!%p2920_p10)
}
  0xf6   : > { %s2924_s16 = scalar_lea.vmem %s558_s0, 1024  ;;  %p2932_p8 = scmp.lt.s32.totalorder %s558_s0, %s558_s0 }
  0xf7   : > { %p2925_p12 = scmp.ne.s32.totalorder %s558_s0, %s2924_s16  ;;  %p2933_p13 = scmp.lt.s32.totalorder %s2924_s16, %s2924_s16 }
  0xf9   : > { %p2927_p4 = pnand %p2925_p12, %p3979_p2  ;;  %p2934_p3 = por %p2933_p13, %p2932_p8 }
  0xfb   : > { %p2928_p11 = pneg %p2927_p4 }
  0xfd   : > { %p2935_p7 = pnand %p2934_p3, %p2928_p11 }
  0xff   : > { %2938 = shalt.err (!%p2935_p7)
}
 0x100   : > { %2560 = dma.hbm_to_vmem [thread:$0]  (!%p3980_p0), %s3891_s11, 1024, %s558_s0, [#allocation18], %s3977_s6, %s3977_s6, %s3976_s3  }
 0x101   : > { %s2939_s12 = scalar_lea.hbm %s3893_s13, 1024 }
 0x102   : > { %p2940_p9 = scmp.ne.s32.totalorder %s3893_s13, %s2939_s12  ;;  %p2946_p5 = scmp.lt.u32.totalorder %s2939_s12, %s3893_s13 }
 0x104   : > { %p2942_p7 = pnand %p2940_p9, %p3979_p2 }
 0x106   : > { %p2943_p1 = pneg %p2942_p7 }
 0x108   : > { %p2948_p6 = pnand %p2946_p5, %p2943_p1 }
 0x10a   : > { %2951 = shalt.err (!%p2948_p6)
}
 0x10b   : > { %s2952_s9 = scalar_lea.vmem %s584_s15, 1024  ;;  %p2960_p11 = scmp.lt.s32.totalorder %s584_s15, %s584_s15 }
 0x10c   : > { %p2953_p10 = scmp.ne.s32.totalorder %s584_s15, %s2952_s9  ;;  %p2961_p8 = scmp.lt.s32.totalorder %s2952_s9, %s2952_s9 }
 0x10e   : > { %p2955_p12 = pnand %p2953_p10, %p3979_p2  ;;  %p2962_p13 = por %p2961_p8, %p2960_p11 }
 0x110   : > { %p2956_p4 = pneg %p2955_p12 }
 0x112   : > { %p2963_p3 = pnand %p2962_p13, %p2956_p4 }
 0x114   : > { %2966 = shalt.err (!%p2963_p3)
}
 0x115   : > { %2566 = dma.hbm_to_vmem [thread:$0]  (!%p3980_p0), %s3893_s13, 1024, %s584_s15, [#allocation21], %s3977_s6, %s3977_s6, %s3976_s3  }
 0x116   : > { %s3157_s8 = smov [#allocation25]   ;;  %s2967_s12 = scalar_lea.hbm %s3898_s18, 16 }
 0x117   : > { %s619_s21 = sshll.u32 %s3157_s8, 4  ;;  %p2968_p9 = scmp.ne.s32.totalorder %s3898_s18, %s2967_s12  ;;  %s620_s21 = int_to_ptr.vmem [resolvable:$true] %s619_s21 }
 0x118   : > { %p2974_p5 = scmp.lt.u32.totalorder %s2967_s12, %s3898_s18 }
 0x119   : > { %p2970_p7 = pnand %p2968_p9, %p3979_p2 }
 0x11b   : > { %p2971_p1 = pneg %p2970_p7 }
 0x11d   : > { %p2976_p6 = pnand %p2974_p5, %p2971_p1 }
 0x11f   : > { %2979 = shalt.err (!%p2976_p6)
}
 0x120   : > { %s2980_s15 = scalar_lea.vmem %s620_s21, 16  ;;  %s2987_s9 = scalar_lea.vmem %s620_s21, 32 }
 0x121   : > { %p2981_p10 = scmp.ne.s32.totalorder %s620_s21, %s2980_s15  ;;  %p2988_p11 = scmp.lt.s32.totalorder %s620_s21, %s620_s21 }
 0x122   : > { %p2989_p8 = scmp.lt.s32.totalorder %s2987_s9, %s2980_s15 }
 0x123   : > { %p2983_p12 = pnand %p2981_p10, %p3979_p2 }
 0x124   : > { %p2990_p13 = por %p2989_p8, %p2988_p11 }
 0x125   : > { %p2984_p4 = pneg %p2983_p12 }
 0x127   : > { %p2991_p3 = pnand %p2990_p13, %p2984_p4 }
 0x129   : > { %2994 = shalt.err (!%p2991_p3)
}
 0x12a   : > { %2572 = dma.hbm_to_vmem [thread:$0]  (!%p3980_p0), %s3898_s18, 16, %s620_s21, [#allocation24]  }
 0x12b   : > { %s3981_s29 = sshll.u32 %s3143_s25, 8  ;;  %s3982_s19 = sld [smem:[#allocation42_spill]] }
 0x12c   : > { %s3983_s2 = sshll.u32 %s3462_s17, 4  ;;  %s2140_s14 = sshll.u32 %s3462_s17, 2 }
 0x12d   : > { %s640_s5 = scalar_lea.vmem [#allocation8], %s3983_s2  ;;  %s637_s27 = scalar_lea.sflag [#allocation9], %s3462_s17 }
 0x12e   : > { %s647_s1 = sshll.u32 %s640_s5, 4  ;;  %p3984_p0 = scmp.ne.s32.totalorder %s3975_s23, 0  ;;  %s3616_s1 = int_to_ptr.vmem [resolvable:$true] %s647_s1 }
 0x131   : > { %s3612_s12 = scalar_lea.hbm %s3982_s19, %s3981_s29  ;;  %s3000_s0 = scalar_lea.hbm %s3982_s19, 512 }
 0x132   : > { %s2995_s15 = scalar_lea.hbm %s3612_s12, 256  ;;  %p3001_p1 = scmp.lt.u32.totalorder %s3612_s12, %s3982_s19 }
 0x133   : > { %p2996_p2 = scmp.ne.s32.totalorder %s3612_s12, %s2995_s15  ;;  %p3002_p5 = scmp.lt.u32.totalorder %s3000_s0, %s2995_s15 }
 0x134   : > { %p3004_p10 = scmp.lt.u32.totalorder %s2995_s15, %s3612_s12 }
 0x135   : > { %p2998_p9 = pnand %p2996_p2, %p3984_p0  ;;  %p3003_p6 = por %p3002_p5, %p3001_p1 }
 0x137   : > { %p2999_p7 = pneg %p2998_p9  ;;  %p3005_p12 = por %p3004_p10, %p3003_p6 }
 0x139   : > { %p3006_p4 = pnand %p3005_p12, %p2999_p7 }
 0x13b   : > { %3009 = shalt.err (!%p3006_p4)
}
 0x13c   : > { %s3010_s8 = scalar_lea.vmem %s3616_s1, 256  ;;  %s3158_s20 = smov [#allocation8]  }
 0x13d   : > { %p3011_p11 = scmp.ne.s32.totalorder %s3616_s1, %s3010_s8  ;;  %s3015_s2 = sshll.u32 %s3158_s20, 4  ;;  %s3016_s2 = int_to_ptr.vmem [resolvable:$false] %s3015_s2 }
 0x13e   : > { %s3017_s5 = scalar_lea.vmem %s3016_s2, 512  ;;  %p3018_p3 = scmp.lt.s32.totalorder %s3616_s1, %s3016_s2 }
 0x13f   : > { %p3013_p8 = pnand %p3011_p11, %p3984_p0  ;;  %p3019_p2 = scmp.lt.s32.totalorder %s3017_s5, %s3010_s8 }
 0x141   : > { %p3014_p13 = pneg %p3013_p8  ;;  %p3020_p9 = por %p3019_p2, %p3018_p3 }
 0x143   : > { %p3021_p1 = pnand %p3020_p9, %p3014_p13 }
 0x145   : > { %3024 = shalt.err (!%p3021_p1)
}
 0x146   : > { %p3985_p7 = scmp.ne.s32.totalorder %s3973_s10, 0  ;;  %s2141_s15 = sshll.u32 %s3143_s25, 6 }
 0x147   : > { %s3986_s0 = sld [smem:[#allocation44_spill]]  ;;  %s682_s29 = scalar_lea.vmem [#allocation13], %s2140_s14 }
 0x148   : > { %2576 = dma.hbm_to_vmem [thread:$0]  (!%p3985_p7), %s3612_s12, 256, %s3616_s1, %s637_s27, %s3977_s6, %s3977_s6, %s3976_s3  }
 0x149   : > { %s689_s8 = sshll.u32 %s682_s29, 4  ;;  %s690_s8 = int_to_ptr.vmem [resolvable:$true] %s689_s8 }
 0x14d   : > { %s3650_s16 = scalar_lea.hbm %s3986_s0, %s2141_s15  ;;  %s3030_s12 = scalar_lea.hbm %s3986_s0, 128 }
 0x14e   : > { %s3025_s20 = scalar_lea.hbm %s3650_s16, 64  ;;  %p3031_p12 = scmp.lt.u32.totalorder %s3650_s16, %s3986_s0 }
 0x14f   : > { %p3026_p5 = scmp.ne.s32.totalorder %s3650_s16, %s3025_s20  ;;  %p3032_p4 = scmp.lt.u32.totalorder %s3030_s12, %s3025_s20 }
 0x150   : > { %p3034_p8 = scmp.lt.u32.totalorder %s3025_s20, %s3650_s16 }
 0x151   : > { %p3028_p6 = pnand %p3026_p5, %p3984_p0  ;;  %p3033_p11 = por %p3032_p4, %p3031_p12 }
 0x153   : > { %p3029_p10 = pneg %p3028_p6  ;;  %p3035_p13 = por %p3034_p8, %p3033_p11 }
 0x155   : > { %p3036_p3 = pnand %p3035_p13, %p3029_p10 }
 0x157   : > { %3039 = shalt.err (!%p3036_p3)
}
 0x158   : > { %s3040_s17 = scalar_lea.vmem %s690_s8, 64  ;;  %s3159_s14 = smov [#allocation13]  }
 0x159   : > { %p3041_p2 = scmp.ne.s32.totalorder %s690_s8, %s3040_s17  ;;  %s3045_s2 = sshll.u32 %s3159_s14, 4  ;;  %s3046_s2 = int_to_ptr.vmem [resolvable:$false] %s3045_s2 }
 0x15a   : > { %s3047_s5 = scalar_lea.vmem %s3046_s2, 128  ;;  %p3048_p5 = scmp.lt.s32.totalorder %s690_s8, %s3046_s2 }
 0x15b   : > { %p3043_p9 = pnand %p3041_p2, %p3984_p0  ;;  %p3049_p6 = scmp.lt.s32.totalorder %s3047_s5, %s3040_s17 }
 0x15d   : > { %p3044_p1 = pneg %p3043_p9  ;;  %p3050_p7 = por %p3049_p6, %p3048_p5 }
 0x15f   : > { %p3051_p4 = pnand %p3050_p7, %p3044_p1 }
 0x161   : > { %3054 = shalt.err (!%p3051_p4)
}
 0x162   : > { %p3987_p12 = scmp.ne.s32.totalorder %s3973_s10, 0  ;;  %p3988_p10 = scmp.ne.s32.totalorder %s3958_s28, 0 }
 0x163   : > { %s3675_s23 = sand.u32 (!%p3988_p10), 1, %s3135_s24   ;;  %p3989_p0 = scmp.ne.s32.totalorder (!%p3988_p10), %s3968_s30, 0 }
 0x164   : > { %2582 = dma.hbm_to_vmem [thread:$0]  (!%p3987_p12), %s3650_s16, 64, %s690_s8, %s3492_s26  }
 0x165   : > { %698 = sbr.rel (%p3988_p10) target bundleno = 2058 (0x80a), region = 96  ;;  %s2143_s15 = sshll.u32 (!%p3988_p10), %s3675_s23, 4 }
 0x166   : > { %s701_s21 = scalar_lea.sflag (!%p3988_p10), [#allocation9], %s3675_s23  ;;  %s3679_s9 = scalar_lea.vmem (!%p3988_p10), [#allocation8], %s2143_s15 }
 0x16c   : > { %3102 = dma.done.wait (%p3989_p0), %s701_s21, 256  }
 0x16d   : > { %3104 = vsyncadd (%p3989_p0), %s701_s21, 4294967040  ;;  %s709_s26 = sand.u32 1, %s3309_s4   ;;  %s3686_s10 = scalar_lea.vmem [#allocation11], %s2143_s15 }
 0x16e   : > { %s710_s28 = scalar_lea.sflag [#allocation12], %s709_s26 }
 0x16f   : > { %3106 = dma.done.wait (%p3989_p0), %s710_s28, 320  }
 0x170   : > { %3108 = vsyncadd (%p3989_p0), %s710_s28, 4294966976  ;;  %s2145_s16 = sshll.u32 %s3675_s23, 2  ;;  %p3990_p7 = scmp.eq.s32.totalorder %s3309_s4, 0 }
 0x171   : > { %s3693_s29 = scalar_lea.vmem [#allocation13], %s2145_s16 }
 0x172   : > { %3110 = dma.done.wait (%p3990_p7), [#allocation15], 2048   ;;  %p3991_p11 = pmov %p3990_p7 }
 0x173   : > { %p3992_p8 = pmov %p3990_p7 }
 0x174   : > { %3112 = vsyncadd (%p3991_p11), [#allocation15], 4294965248 }
 0x175   : > { %3114 = dma.done.wait (%p3992_p8), [#allocation18], 2048   ;;  %p3993_p13 = pmov %p3990_p7 }
 0x176   : > { %p3994_p3 = pmov %p3990_p7 }
 0x177   : > { %3116 = vsyncadd (%p3993_p13), [#allocation18], 4294965248 }
 0x178   : > { %3118 = dma.done.wait (%p3994_p3), [#allocation21], 2048   ;;  %p3995_p2 = pmov %p3994_p3 }
 0x17a   : > { %3120 = vsyncadd (%p3995_p2), [#allocation21], 4294965248  ;;  %p3996_p9 = pmov %p3995_p2 }
 0x17b   : > { %p3997_p1 = pmov %p3995_p2 }
 0x17c   : > { %3122 = dma.done.wait (%p3996_p9), [#allocation24], 1040  }
 0x17d   : > { %3124 = vsyncadd (%p3997_p1), [#allocation24], 4294966256  ;;  %v2651_v0 = vld [vmem:[#allocation14] sm:$0xff]   ;;  %v2652_v1 = vld [vmem:[#allocation14 + $0x8] sm:$0xff]   ;;  %vm972_vm0 = vcmask 261120   ;;  %v3160_v41 = vmov 0.0  }
 0x17e   : > { %2324 = vmatprep.subr.bf16.mxu0 %v2651_v0  ;;  %v2653_v2 = vld [vmem:[#allocation14 + $0x10] sm:$0xff]   ;;  %v2654_v3 = vld [vmem:[#allocation14 + $0x18] sm:$0xff]   ;;  %v2655_v5 = vld [vmem:[#allocation14 + $0x20] sm:$0xff]   ;;  %1213 = vst [vmem:[#allocation3] sm:$0xff] %v3160_v41  ;;  %vm3161_vm1 = vmmov 0   ;;  %s3998_s6 = sld [smem:[#allocation47_spill]] }
 0x17f   : > { %2325 = vmatpush3.bf16.msra.mxu0 %v2651_v0  ;;  %v2659_v4 = vld [vmem:[%s3679_s9] sm:$0xff]   ;;  %v2657_v7 = vld [vmem:[#allocation14 + $0x30] sm:$0xff]   ;;  %v2663_v17 = vld [vmem:[#allocation16] sm:$0xff]   ;;  %1214 = vst [vmem:[#allocation4] sm:$0xff] %v3160_v41  ;;  %s2181_s12 = sshll.u32 %s3309_s4, 1  ;;  %s4000_s30 = sld [smem:[#allocation51_spill]] }
 0x180   : > { %2326 = vmatprep.subr.bf16.mxu0 %v2652_v1  ;;  %2340 = vmatprep.mubr.bf16.mxu0 %v2659_v4  ;;  %v2656_v6 = vld [vmem:[#allocation14 + $0x28] sm:$0xff]   ;;  %v2658_v8 = vld [vmem:[#allocation14 + $0x38] sm:$0xff]   ;;  %v2660_v9 = vld [vmem:[%s3679_s9 + $0x8] sm:$0xff]   ;;  %s1224_s1 = sadd.s32 1, %s2181_s12  ;;  %s1216_s27 = sld [smem:[#allocation6 + %s2181_s12]] }
 0x181   : > { %v2661_v10 = vld [vmem:[%s3686_s10] sm:$0xff]   ;;  %v3717_v18 = vld [vmem:[%s3686_s10 + $0x8] sm:$0xff]   ;;  %s1217_s17 = sld [smem:[#allocation7 + %s2181_s12]]  ;;  %s2154_s12 = sshll.u32 %s3675_s23, 3 }
 0x182   : > { %2348 = vmatprep.mubr.msk.bf16.mxu1 %vm972_vm0, %v2661_v10  ;;  %v2664_v19 = vld [vmem:[#allocation16 + $0x8] sm:$0xff]   ;;  %v2665_v20 = vld [vmem:[#allocation16 + $0x10] sm:$0xff]   ;;  %v2666_v21 = vld [vmem:[#allocation16 + $0x18] sm:$0xff]   ;;  %s1225_s14 = sld [smem:[#allocation6 + %s1224_s1]]  ;;  %s1917_s16 = scalar_lea.sflag [#allocation10], %s3675_s23 }
 0x183   : > { %2327 = vmatpush3.bf16.msra.mxu0 %v2652_v1  ;;  %v2667_v22 = vld [vmem:[#allocation16 + $0x20] sm:$0xff]   ;;  %v2668_v23 = vld [vmem:[#allocation16 + $0x28] sm:$0xff]   ;;  %v2669_v24 = vld [vmem:[#allocation16 + $0x30] sm:$0xff]   ;;  %s1226_s2 = sld [smem:[#allocation7 + %s1224_s1]] }
 0x184   : > { %2328 = vmatprep.subr.bf16.mxu0 %v2653_v2  ;;  %v2670_v25 = vld [vmem:[#allocation16 + $0x38] sm:$0xff]   ;;  %v2165_v26 = vld [vmem:[%s3887_s7] ss:$0 sm:$0xff]  ;;  %v2679_v42 = vld [vmem:[#allocation20] sm:$0xff]   ;;  %s3999_s10 = sld [smem:[#allocation49_spill]]  ;;  %s4001_s3 = sld [smem:[#allocation52_spill]] }
 0x185   : > { %v2680_v43 = vld [vmem:[#allocation20 + $0x8] sm:$0xff]   ;;  %v2671_v50 = vld [vmem:[#allocation17] sm:$0xff]   ;;  %v2673_v52 = vld [vmem:[#allocation17 + $0x10] sm:$0xff]   ;;  %s4002_s1 = sld [smem:[#allocation55_spill]]  ;;  %s4007_s28 = sld [smem:[#allocation57_spill]] }
 0x186   : > { %v2672_v51 = vld [vmem:[#allocation17 + $0x8] sm:$0xff]   ;;  %v2674_v53 = vld [vmem:[#allocation17 + $0x18] sm:$0xff]   ;;  %v2675_v54 = vld [vmem:[#allocation17 + $0x20] sm:$0xff]   ;;  %s1218_s5 = scalar_lea.vmem [#allocation2], %s1216_s27 }
 0x187   : > { %2329 = vmatpush3.bf16.msra.mxu0 %v2653_v2  ;;  %v2676_v55 = vld [vmem:[#allocation17 + $0x28] sm:$0xff]   ;;  %v2677_v56 = vld [vmem:[#allocation17 + $0x30] sm:$0xff]   ;;  %v2678_v57 = vld [vmem:[#allocation17 + $0x38] sm:$0xff]   ;;  %s1221_s15 = scalar_lea.vmem [#allocation2], %s1217_s17 }
 0x188   : > { %2330 = vmatprep.subr.bf16.mxu0 %v2654_v3  ;;  %v1237_v58 = vld [vmem:[%s3693_s29] sm:$0xf]  ;;  %v2681_v59 = vld [vmem:[#allocation20 + $0x10] sm:$0xff]   ;;  %v2683_v61 = vld [vmem:[#allocation20 + $0x20] sm:$0xff]   ;;  %s1227_s21 = scalar_lea.vmem [#allocation2], %s1225_s14  ;;  %s4005_s14 = sld [smem:[#allocation56_spill]] }
 0x189   : > { %v2682_v60 = vld [vmem:[#allocation20 + $0x18] sm:$0xff]   ;;  %v2684_v62 = vld [vmem:[#allocation20 + $0x28] sm:$0xff]   ;;  %v2685_v63 = vld [vmem:[#allocation20 + $0x30] sm:$0xff]   ;;  %s1230_s9 = scalar_lea.vmem [#allocation2], %s1226_s2  ;;  %s4006_s2 = sld [smem:[#allocation39_spill]] }
 0x18a   : > { %v2686_v0 = vld [vmem:[#allocation20 + $0x38] sm:$0xff]   ;;  %v2703_v1 = vld [vmem:[#allocation23] sm:$0xff]   ;;  %v2704_v2 = vld [vmem:[#allocation23 + $0x8] sm:$0xff]   ;;  %s3162_s29 = smov [#allocation26]  }
 0x18b   : > { %2331 = vmatpush3.bf16.msra.mxu0 %v2654_v3  ;;  %v2705_v3 = vld [vmem:[#allocation23 + $0x10] sm:$0xff]   ;;  %v2706_v4 = vld [vmem:[#allocation23 + $0x18] sm:$0xff]   ;;  %s4003_s27 = smov %s4002_s1 }
 0x18c   : > { %2332 = vmatprep.subr.bf16.mxu0 %v2655_v5 }
 0x18f   : > { %2333 = vmatpush3.bf16.msra.mxu0 %v2655_v5  ;;  %v2707_v5 = vld [vmem:[#allocation23 + $0x20] sm:$0xff]   ;;  %p4008_p6 = scmp.ne.s32.totalorder %s4006_s2, 0 }
 0x190   : > { %2334 = vmatprep.subr.bf16.mxu0 %v2656_v6 }
 0x193   : > { %2335 = vmatpush3.bf16.msra.mxu0 %v2656_v6  ;;  %v2708_v6 = vld [vmem:[#allocation23 + $0x28] sm:$0xff]  }
 0x194   : > { %2336 = vmatprep.subr.bf16.mxu0 %v2657_v7 }
 0x197   : > { %2337 = vmatpush3.bf16.msra.mxu0 %v2657_v7  ;;  %v2178_v7 = vld [vmem:[%s3998_s6] ss:$0 sm:$0xff]  ;;  %s4004_s6 = sld [smem:[#allocation54_spill]] }
 0x198   : > { %2338 = vmatprep.subr.bf16.mxu0 %v2658_v8 }
 0x19b   : > { %2339 = vmatpush3.bf16.msra.mxu0 %v2658_v8 }
 0x19e   : > { %2341 = vmatmul.mubr.bf16.vlgmr.msra.gmra.mrb[0].mxu0 %v2660_v9 }
 0x19f   : > { %2376 = vmatprep.mubr.msk.bf16.mxu0 %vm972_vm0, %v2661_v10 }
 0x271   : > { %v2342_v11 = vpop.f32.mrb[0].mxu0 }
 0x272   : > { %v938_v12 = vpop.f32.mrb[1].mxu0 }
 0x273   : > { %v2343_v13 = vpop.f32.mrb[2].mxu0 }
 0x274   : > { %v954_v14 = vpack.c.bf16 %v2343_v13, %v2342_v11  ;;  %v941_v15 = vpop.f32.mrb[3].mxu0 }
 0x275   : > { %v953_v16 = vpack.c.bf16 %v941_v15, %v938_v12 }
 0x277   : > { %2344 = vmatprep.subr.bf16.mxu1 %v953_v16 }
 0x278   : > { %2345 = vmatpush3.bf16.msra.mxu1 %v953_v16 }
 0x279   : > { %2346 = vmatprep.subr.bf16.mxu1 %v954_v14 }
 0x27c   : > { %2347 = vmatpush3.bf16.msra.mxu1 %v954_v14 }
 0x27d   : > { %2352 = vmatprep.subr.bf16.mxu1 %v2663_v17 }
 0x27f   : > { %2349 = vmatmul.mubr.msk.bf16.vlgmr.msra.gmra.mrb[0].mxu1 %vm972_vm0, %v3717_v18 }
 0x280   : > { %2353 = vmatpush3.bf16.msra.mxu1 %v2663_v17 }
 0x281   : > { %2354 = vmatprep.subr.bf16.mxu1 %v2664_v19 }
 0x284   : > { %2355 = vmatpush3.bf16.msra.mxu1 %v2664_v19 }
 0x285   : > { %2356 = vmatprep.subr.bf16.mxu1 %v2665_v20 }
 0x288   : > { %2357 = vmatpush3.bf16.msra.mxu1 %v2665_v20 }
 0x289   : > { %2358 = vmatprep.subr.bf16.mxu1 %v2666_v21 }
 0x28c   : > { %2359 = vmatpush3.bf16.msra.mxu1 %v2666_v21 }
 0x28d   : > { %2360 = vmatprep.subr.bf16.mxu1 %v2667_v22 }
 0x290   : > { %2361 = vmatpush3.bf16.msra.mxu1 %v2667_v22 }
 0x291   : > { %2362 = vmatprep.subr.bf16.mxu1 %v2668_v23 }
 0x294   : > { %2363 = vmatpush3.bf16.msra.mxu1 %v2668_v23 }
 0x295   : > { %2364 = vmatprep.subr.bf16.mxu1 %v2669_v24 }
 0x298   : > { %2365 = vmatpush3.bf16.msra.mxu1 %v2669_v24 }
 0x299   : > { %2366 = vmatprep.subr.bf16.mxu1 %v2670_v25 }
 0x29c   : > { %2367 = vmatpush3.bf16.msra.mxu1 %v2670_v25  ;;  %v2687_v25 = vld [vmem:[#allocation19] sm:$0xff]  }
 0x29d   : > { %2400 = vmatprep.subr.bf16.mxu1 %v3160_v41 }
 0x352   : > { %v2350_v27 = vpop.f32.mrb[0].mxu1 }
 0x353   : > { %v1022_v28 = vadd.f32 %v2350_v27, %v2165_v26  ;;  %v1013_v29 = vpop.f32.mrb[1].mxu1  ;;  %v2688_v27 = vld [vmem:[#allocation19 + $0x8] sm:$0xff]  }
 0x354   : > { %v1014_v30 = vadd.f32 %v2165_v26, %v1013_v29  ;;  %v2351_v31 = vpop.f32.mrb[2].mxu1 }
 0x355   : > { %v1025_v32 = vadd.f32 %v2351_v31, %v2165_v26  ;;  %v1016_v33 = vpop.f32.mrb[3].mxu1  ;;  %v1030_v35 = vmax.f32 %v1022_v28, 0.0  ;;  %v2689_v28 = vld [vmem:[#allocation19 + $0x10] sm:$0xff]  }
 0x356   : > { %v1017_v34 = vadd.f32 %v2165_v26, %v1016_v33  ;;  %v1028_v37 = vmax.f32 %v1014_v30, 0.0  ;;  %v2690_v33 = vld [vmem:[#allocation19 + $0x18] sm:$0xff]  }
 0x357   : > { %v1031_v36 = vmax.f32 %v1025_v32, 0.0 }
 0x358   : > { %v1029_v38 = vmax.f32 %v1017_v34, 0.0  ;;  %v2691_v34 = vld [vmem:[#allocation19 + $0x20] sm:$0xff]  }
 0x359   : > { %v1033_v39 = vpack.c.bf16 %v1031_v36, %v1030_v35  ;;  %v2692_v35 = vld [vmem:[#allocation19 + $0x28] sm:$0xff]   ;;  %v2693_v36 = vld [vmem:[#allocation19 + $0x30] sm:$0xff]  }
 0x35a   : > { %v1032_v40 = vpack.c.bf16 %v1029_v38, %v1028_v37  ;;  %v2694_v37 = vld [vmem:[#allocation19 + $0x38] sm:$0xff]  }
 0x35c   : > { %2368 = vmatprep.mubr.bf16.mxu1 %v1032_v40 }
 0x35d   : > { %2369 = vmatmul.mubr.bf16.vlgmr.msra.gmra.mrb[4].mxu1 %v1033_v39  ;;  %v2695_v39 = vld [vmem:[#allocation22] sm:$0xff]  }
 0x35e   : > { %2416 = vmatprep.mubr.msk.bf16.mxu1 %vm3161_vm1, %v3160_v41  ;;  %2401 = vmatpush3.bf16.msra.mxu1 %v2679_v42  ;;  %v2696_v42 = vld [vmem:[#allocation22 + $0x8] sm:$0xff]  }
 0x35f   : > { %2402 = vmatprep.subr.bf16.mxu1 %v3160_v41 }
 0x362   : > { %2403 = vmatpush3.bf16.msra.mxu1 %v2680_v43  ;;  %v2697_v43 = vld [vmem:[#allocation22 + $0x10] sm:$0xff]  }
 0x363   : > { %2404 = vmatprep.subr.bf16.mxu1 %v3160_v41 }
 0x366   : > { %2405 = vmatpush3.bf16.msra.mxu1 %v2681_v59 }
 0x367   : > { %2406 = vmatprep.subr.bf16.mxu1 %v3160_v41 }
 0x36a   : > { %2407 = vmatpush3.bf16.msra.mxu1 %v2682_v60 }
 0x36b   : > { %2408 = vmatprep.subr.bf16.mxu1 %v3160_v41 }
 0x36e   : > { %2409 = vmatpush3.bf16.msra.mxu1 %v2683_v61 }
 0x36f   : > { %2410 = vmatprep.subr.bf16.mxu1 %v3160_v41 }
 0x372   : > { %2411 = vmatpush3.bf16.msra.mxu1 %v2684_v62 }
 0x373   : > { %2412 = vmatprep.subr.bf16.mxu1 %v3160_v41 }
 0x376   : > { %2413 = vmatpush3.bf16.msra.mxu1 %v2685_v63 }
 0x377   : > { %2414 = vmatprep.subr.bf16.mxu1 %v3160_v41 }
 0x37a   : > { %2415 = vmatpush3.bf16.msra.mxu1 %v2686_v0  ;;  %v2711_v0 = vld [vmem:[%s4002_s1] sm:$0xff]  }
 0x37b   : > { %2420 = vmatprep.subr.bf16.mxu1 %v3160_v41 }
 0x430   : > { %v2370_v44 = vpop.f32.mrb[4].mxu1 }
 0x431   : > { %v1132_v45 = vpop.f32.mrb[5].mxu1 }
 0x432   : > { %v2371_v46 = vpop.f32.mrb[6].mxu1 }
 0x433   : > { %v1148_v47 = vpack.c.bf16 %v2371_v46, %v2370_v44  ;;  %v1135_v48 = vpop.f32.mrb[7].mxu1  ;;  %v2698_v44 = vld [vmem:[#allocation22 + $0x18] sm:$0xff]   ;;  %v2700_v46 = vld [vmem:[#allocation22 + $0x28] sm:$0xff]  }
 0x434   : > { %v1147_v49 = vpack.c.bf16 %v1135_v48, %v1132_v45  ;;  %v2699_v45 = vld [vmem:[#allocation22 + $0x20] sm:$0xff]  }
 0x436   : > { %2372 = vmatprep.subr.bf16.mxu0 %v1147_v49 }
 0x437   : > { %2373 = vmatpush3.bf16.msra.mxu0 %v1147_v49  ;;  %v2701_v49 = vld [vmem:[#allocation22 + $0x30] sm:$0xff]  }
 0x438   : > { %2374 = vmatprep.subr.bf16.mxu0 %v1148_v47 }
 0x43b   : > { %2375 = vmatpush3.bf16.msra.mxu0 %v1148_v47  ;;  %v2182_v47 = vld [vmem:[%s3999_s10] ss:$0 sm:$0xff] }
 0x43c   : > { %2380 = vmatprep.subr.bf16.mxu0 %v3160_v41 }
 0x43e   : > { %2377 = vmatmul.mubr.msk.bf16.vlgmr.msra.gmra.mrb[4].mxu0 %vm972_vm0, %v3717_v18 }
 0x43f   : > { %2381 = vmatpush3.bf16.msra.mxu0 %v2671_v50  ;;  %2396 = vmatprep.mubr.msk.bf16.mxu0 %vm3161_vm1, %v3160_v41 }
 0x440   : > { %2382 = vmatprep.subr.bf16.mxu0 %v3160_v41 }
 0x443   : > { %2383 = vmatpush3.bf16.msra.mxu0 %v2672_v51  ;;  %v2702_v51 = vld [vmem:[#allocation22 + $0x38] sm:$0xff]  }
 0x444   : > { %2384 = vmatprep.subr.bf16.mxu0 %v3160_v41 }
 0x447   : > { %2385 = vmatpush3.bf16.msra.mxu0 %v2673_v52 }
 0x448   : > { %2386 = vmatprep.subr.bf16.mxu0 %v3160_v41 }
 0x44b   : > { %2387 = vmatpush3.bf16.msra.mxu0 %v2674_v53  ;;  %v2709_v53 = vld [vmem:[#allocation23 + $0x30] sm:$0xff]  }
 0x44c   : > { %2388 = vmatprep.subr.bf16.mxu0 %v3160_v41 }
 0x44f   : > { %2389 = vmatpush3.bf16.msra.mxu0 %v2675_v54  ;;  %v2710_v54 = vld [vmem:[#allocation23 + $0x38] sm:$0xff]  }
 0x450   : > { %2390 = vmatprep.subr.bf16.mxu0 %v3160_v41 }
 0x453   : > { %2391 = vmatpush3.bf16.msra.mxu0 %v2676_v55  ;;  %v2215_v55 = vld [vmem:[%s4000_s30] ss:$0 sm:$0xff]  ;;  %s3059_s30 = sshll.u32 %s3162_s29, 4  ;;  %s3060_s30 = int_to_ptr.vmem [resolvable:$false] %s3059_s30 }
 0x454   : > { %2392 = vmatprep.subr.bf16.mxu0 %v3160_v41  ;;  %s3061_s8 = scalar_lea.vmem %s3060_s30, 256 }
 0x457   : > { %2393 = vmatpush3.bf16.msra.mxu0 %v2677_v56 }
 0x458   : > { %2394 = vmatprep.subr.bf16.mxu0 %v3160_v41 }
 0x45b   : > { %2395 = vmatpush3.bf16.msra.mxu0 %v2678_v57  ;;  %v2216_v57 = vld [vmem:[%s4001_s3] ss:$0 sm:$0xff] }
 0x45c   : > { %2460 = vmatprep.subr.bf16.mxu0 %v3160_v41 }
 0x45e   : > { %2397 = vmatmul.mubr.bf16.vlgmr.msra.gmra.mrb[8].mxu0 %v1237_v58 }
 0x45f   : > { %2476 = vmatprep.mubr.msk.bf16.mxu0 %vm3161_vm1, %v3160_v41  ;;  %2461 = vmatpush3.bf16.msra.mxu0 %v2703_v1 }
 0x460   : > { %2462 = vmatprep.subr.bf16.mxu0 %v3160_v41 }
 0x463   : > { %2463 = vmatpush3.bf16.msra.mxu0 %v2704_v2  ;;  %v2712_v2 = vld [vmem:[%s4003_s27 + $0x8] sm:$0xff]  }
 0x464   : > { %2464 = vmatprep.subr.bf16.mxu0 %v3160_v41 }
 0x467   : > { %2465 = vmatpush3.bf16.msra.mxu0 %v2705_v3  ;;  %v2713_v3 = vld [vmem:[%s4003_s27 + $0x10] sm:$0xff]  }
 0x468   : > { %2466 = vmatprep.subr.bf16.mxu0 %v3160_v41 }
 0x46b   : > { %2467 = vmatpush3.bf16.msra.mxu0 %v2706_v4  ;;  %v2714_v4 = vld [vmem:[%s4003_s27 + $0x18] sm:$0xff]  }
 0x46c   : > { %2468 = vmatprep.subr.bf16.mxu0 %v3160_v41 }
 0x46f   : > { %2469 = vmatpush3.bf16.msra.mxu0 %v2707_v5  ;;  %v2715_v5 = vld [vmem:[%s4003_s27 + $0x20] sm:$0xff]  }
 0x470   : > { %2470 = vmatprep.subr.bf16.mxu0 %v3160_v41 }
 0x473   : > { %2471 = vmatpush3.bf16.msra.mxu0 %v2708_v6  ;;  %v2716_v6 = vld [vmem:[%s4003_s27 + $0x28] sm:$0xff]  }
 0x474   : > { %2472 = vmatprep.subr.bf16.mxu0 %v3160_v41 }
 0x477   : > { %2473 = vmatpush3.bf16.msra.mxu0 %v2709_v53 }
 0x478   : > { %2474 = vmatprep.subr.bf16.mxu0 %v3160_v41 }
 0x47b   : > { %2475 = vmatpush3.bf16.msra.mxu0 %v2710_v54 }
 0x47c   : > { %2480 = vmatprep.subr.bf16.mxu0 %v3160_v41 }
 0x511   : > { %v2378_v8 = vpop.f32.mrb[4].mxu0 }
 0x512   : > { %v1199_v9 = vadd.f32 %v2378_v8, %v2178_v7  ;;  %v1190_v10 = vpop.f32.mrb[5].mxu0  ;;  %v2718_v8 = vld [vmem:[%s4003_s27 + $0x38] sm:$0xff]  }
 0x513   : > { %v1191_v11 = vadd.f32 %v2178_v7, %v1190_v10  ;;  %v2379_v12 = vpop.f32.mrb[6].mxu0 }
 0x514   : > { %v1207_v13 = vmax.f32 %v1199_v9, 0.0  ;;  %v1202_v14 = vadd.f32 %v2379_v12, %v2178_v7  ;;  %v1193_v15 = vpop.f32.mrb[7].mxu0  ;;  %v2225_v9 = vld [vmem:[%s4004_s6] ss:$0 sm:$0xff] }
 0x515   : > { %v1205_v16 = vmax.f32 %v1191_v11, 0.0  ;;  %v1194_v17 = vadd.f32 %v2178_v7, %v1193_v15  ;;  %v2717_v7 = vld [vmem:[%s4003_s27 + $0x30] sm:$0xff]   ;;  %v2226_v11 = vld [vmem:[#allocation25] ss:$0 sm:$0xff] }
 0x516   : > { %1211 = vst [vmem:[#allocation2 + $0x10] sm:$0xff] %v1207_v13  ;;  %v1208_v18 = vmax.f32 %v1202_v14, 0.0 }
 0x517   : > { %1209 = vst [vmem:[#allocation2] sm:$0xff] %v1205_v16  ;;  %v1206_v19 = vmax.f32 %v1194_v17, 0.0 }
 0x518   : > { %1212 = vst [vmem:[#allocation2 + $0x18] sm:$0xff] %v1208_v18  ;;  %v2227_v18 = vld [vmem:[%s4005_s14] ss:$0 sm:$0xff] }
 0x519   : > { %1210 = vst [vmem:[#allocation2 + $0x8] sm:$0xff] %v1206_v19 }
 0x520   : > { %v1219_v20 = vld [vmem:[%s1218_s5] sm:$0x1]  ;;  %s2237_s5 = sshll.u32 %s3309_s4, 7 }
 0x521   : > { %v1222_v21 = vld [vmem:[%s1221_s15] sm:$0x1]  ;;  %1220 = vst [vmem:[#allocation3] sm:$0x1] %v1219_v20  ;;  %s818_s15 = scalar_lea.vmem [#allocation26], %s2154_s12  ;;  %s3837_s10 = scalar_lea.hbm %s4007_s28, %s2237_s5 }
 0x522   : > { %v1228_v22 = vld [vmem:[%s1227_s21] sm:$0x1]  ;;  %1223 = vst [vmem:[#allocation4] sm:$0x1] %v1222_v21  ;;  %s1930_s21 = sshll.u32 %s818_s15, 4  ;;  %s3839_s21 = int_to_ptr.vmem [resolvable:$true] %s1930_s21 }
 0x523   : > { %1229 = vst [vmem:[#allocation3 + $0x1] sm:$0x1] %v1228_v22  ;;  %v1231_v23 = vld [vmem:[%s1230_s9] sm:$0x1]  ;;  %s3055_s4 = scalar_lea.vmem %s3839_s21, 128  ;;  %p3062_p10 = scmp.lt.s32.totalorder %s3839_s21, %s3060_s30 }
 0x524   : > { %1232 = vst [vmem:[#allocation4 + $0x1] sm:$0x1] %v1231_v23  ;;  %p3056_p5 = scmp.ne.s32.totalorder %s3839_s21, %s3055_s4  ;;  %p3063_p0 = scmp.lt.s32.totalorder %s3061_s8, %s3055_s4 }
 0x526   : > { %p3057_p4 = pnand %p3056_p5, %p4008_p6  ;;  %p3064_p7 = por %p3063_p0, %p3062_p10 }
 0x528   : > { %p3058_p12 = pneg %p3057_p4 }
 0x52a   : > { %v1233_v38 = vld [vmem:[#allocation3] sm:$0xff]  ;;  %p3065_p11 = pnand %p3064_p7, %p3058_p12 }
 0x52b   : > { %v1235_v24 = vld [vmem:[#allocation4] sm:$0xff]  ;;  %v1234_v40 = vpack.c.bf16 %v1233_v38, %v1233_v38 }
 0x52c   : > { %v1236_v26 = vpack.c.bf16 %v1235_v24, %v1235_v24 }
 0x52e   : > { %2417 = vmatmul.mubr.bf16.vlgmr.msra.gmra.mrb[8].mxu1 %v1236_v26 }
 0x52f   : > { %2421 = vmatpush3.bf16.msra.mxu1 %v2687_v25  ;;  %2436 = vmatprep.mubr.msk.bf16.mxu1 %vm3161_vm1, %v3160_v41 }
 0x530   : > { %2422 = vmatprep.subr.bf16.mxu1 %v3160_v41 }
 0x531   : > { %v1343_v29 = vpop.f32.mrb[8].mxu0 }
 0x532   : > { %v2398_v30 = vpop.f32.mrb[9].mxu0  ;;  %v1344_v48 = vadd.f32 %v2182_v47, %v1343_v29 }
 0x533   : > { %2423 = vmatpush3.bf16.msra.mxu1 %v2688_v27  ;;  %v1346_v31 = vpop.f32.mrb[10].mxu0 }
 0x534   : > { %2424 = vmatprep.subr.bf16.mxu1 %v3160_v41  ;;  %v2399_v32 = vpop.f32.mrb[11].mxu0  ;;  %v1349_v50 = vmax.f32 %v1344_v48, 0.0 }
 0x536   : > { %v1558_v52 = vpack.c.bf16 %v1349_v50, %v1349_v50 }
 0x537   : > { %2425 = vmatpush3.bf16.msra.mxu1 %v2689_v28 }
 0x538   : > { %2426 = vmatprep.subr.bf16.mxu1 %v3160_v41 }
 0x53b   : > { %2427 = vmatpush3.bf16.msra.mxu1 %v2690_v33 }
 0x53c   : > { %2428 = vmatprep.subr.bf16.mxu1 %v3160_v41 }
 0x53f   : > { %2429 = vmatpush3.bf16.msra.mxu1 %v2691_v34 }
 0x540   : > { %2430 = vmatprep.subr.bf16.mxu1 %v3160_v41 }
 0x543   : > { %2431 = vmatpush3.bf16.msra.mxu1 %v2692_v35 }
 0x544   : > { %2432 = vmatprep.subr.bf16.mxu1 %v3160_v41 }
 0x547   : > { %2433 = vmatpush3.bf16.msra.mxu1 %v2693_v36 }
 0x548   : > { %2434 = vmatprep.subr.bf16.mxu1 %v3160_v41 }
 0x54b   : > { %2435 = vmatpush3.bf16.msra.mxu1 %v2694_v37 }
 0x54c   : > { %2440 = vmatprep.subr.bf16.mxu1 %v3160_v41 }
 0x54e   : > { %2437 = vmatmul.mubr.bf16.vlgmr.msra.gmra.mrb[8].mxu1 %v1234_v40 }
 0x54f   : > { %2441 = vmatpush3.bf16.msra.mxu1 %v2695_v39  ;;  %2456 = vmatprep.mubr.msk.bf16.mxu1 %vm3161_vm1, %v3160_v41 }
 0x550   : > { %2442 = vmatprep.subr.bf16.mxu1 %v3160_v41 }
 0x553   : > { %2443 = vmatpush3.bf16.msra.mxu1 %v2696_v42 }
 0x554   : > { %2444 = vmatprep.subr.bf16.mxu1 %v3160_v41 }
 0x557   : > { %2445 = vmatpush3.bf16.msra.mxu1 %v2697_v43 }
 0x558   : > { %2446 = vmatprep.subr.bf16.mxu1 %v3160_v41 }
 0x55b   : > { %2447 = vmatpush3.bf16.msra.mxu1 %v2698_v44 }
 0x55c   : > { %2448 = vmatprep.subr.bf16.mxu1 %v3160_v41 }
 0x55f   : > { %2449 = vmatpush3.bf16.msra.mxu1 %v2699_v45 }
 0x560   : > { %2450 = vmatprep.subr.bf16.mxu1 %v3160_v41 }
 0x563   : > { %2451 = vmatpush3.bf16.msra.mxu1 %v2700_v46 }
 0x564   : > { %2452 = vmatprep.subr.bf16.mxu1 %v3160_v41 }
 0x567   : > { %2453 = vmatpush3.bf16.msra.mxu1 %v2701_v49 }
 0x568   : > { %2454 = vmatprep.subr.bf16.mxu1 %v3160_v41 }
 0x56b   : > { %2455 = vmatpush3.bf16.msra.mxu1 %v2702_v51 }
 0x56e   : > { %2457 = vmatmul.mubr.bf16.vlgmr.msra.gmra.mrb[8].mxu1 %v1558_v52 }
 0x641   : > { %v1657_v56 = vpop.f32.mrb[8].mxu1 }
 0x642   : > { %v1671_v58 = vmul.f32 %v2215_v55, %v1657_v56  ;;  %v2458_v59 = vpop.f32.mrb[9].mxu1 }
 0x643   : > { %v1660_v60 = vpop.f32.mrb[10].mxu1 }
 0x644   : > { %v1679_v61 = vadd.f32 %v2216_v57, %v1671_v58  ;;  %v2459_v62 = vpop.f32.mrb[11].mxu1 }
 0x646   : > { %v1680_v63 = vmax.f32 %v1679_v61, 0.0 }
 0x648   : > { %v1681_v1 = vpack.c.bf16 %v1680_v63, %v1680_v63 }
 0x64a   : > { %2477 = vmatmul.mubr.bf16.vlgmr.msra.gmra.mrb[12].mxu0 %v1681_v1 }
 0x64b   : > { %2481 = vmatpush3.bf16.msra.mxu0 %v2711_v0  ;;  %2496 = vmatprep.mubr.msk.bf16.mxu0 %vm3161_vm1, %v3160_v41 }
 0x64c   : > { %2482 = vmatprep.subr.bf16.mxu0 %v3160_v41 }
 0x64f   : > { %2483 = vmatpush3.bf16.msra.mxu0 %v2712_v2 }
 0x650   : > { %2484 = vmatprep.subr.bf16.mxu0 %v3160_v41 }
 0x653   : > { %2485 = vmatpush3.bf16.msra.mxu0 %v2713_v3 }
 0x654   : > { %2486 = vmatprep.subr.bf16.mxu0 %v3160_v41 }
 0x657   : > { %2487 = vmatpush3.bf16.msra.mxu0 %v2714_v4 }
 0x658   : > { %2488 = vmatprep.subr.bf16.mxu0 %v3160_v41 }
 0x65b   : > { %2489 = vmatpush3.bf16.msra.mxu0 %v2715_v5 }
 0x65c   : > { %2490 = vmatprep.subr.bf16.mxu0 %v3160_v41 }
 0x65f   : > { %2491 = vmatpush3.bf16.msra.mxu0 %v2716_v6 }
 0x660   : > { %2492 = vmatprep.subr.bf16.mxu0 %v3160_v41 }
 0x663   : > { %2493 = vmatpush3.bf16.msra.mxu0 %v2717_v7 }
 0x664   : > { %2494 = vmatprep.subr.bf16.mxu0 %v3160_v41 }
 0x667   : > { %2495 = vmatpush3.bf16.msra.mxu0 %v2718_v8 }
 0x71d   : > { %v1780_v10 = vpop.f32.mrb[12].mxu0 }
 0x71e   : > { %v1793_v12 = vmul.f32 %v2225_v9, %v1780_v10  ;;  %v2478_v13 = vpop.f32.mrb[13].mxu0 }
 0x71f   : > { %v1783_v14 = vpop.f32.mrb[14].mxu0 }
 0x720   : > { %v1801_v15 = vadd.f32 %v2226_v11, %v1793_v12  ;;  %v2479_v16 = vpop.f32.mrb[15].mxu0 }
 0x722   : > { %v1802_v17 = vmax.f32 %v1801_v15, 0.0 }
 0x724   : > { %v1803_v41 = vpack.c.bf16 %v1802_v17, %v1802_v17 }
 0x726   : > { %2497 = vmatmul.mubr.bf16.vlgmr.msra.gmra.mrb[16].mxu0 %v1803_v41 }
 0x7f9   : > { %v1909_v19 = vpop.f32.mrb[16].mxu0 }
 0x7fa   : > { %v1910_v20 = vadd.f32 %v2227_v18, %v1909_v19  ;;  %v2498_v21 = vpop.f32.mrb[17].mxu0 }
 0x7fb   : > { %v1912_v22 = vpop.f32.mrb[18].mxu0 }
 0x7fc   : > { %1915 = vst [vmem:[%s818_s15] sm:$0xff] %v1910_v20  ;;  %v2499_v23 = vpop.f32.mrb[19].mxu0 }
 0x7fd   : > { %3068 = shalt.err (!%p3065_p11)
}
 0x7fe   : > { %s3069_s23 = scalar_lea.hbm %s3837_s10, 128  ;;  %s3073_s6 = scalar_lea.hbm %s4007_s28, 256 }
 0x7ff   : > { %p3070_p8 = scmp.ne.s32.totalorder %s3837_s10, %s3069_s23  ;;  %p3074_p2 = scmp.lt.u32.totalorder %s3837_s10, %s4007_s28 }
 0x800   : > { %p3075_p9 = scmp.lt.u32.totalorder %s3073_s6, %s3069_s23  ;;  %p3077_p5 = scmp.lt.u32.totalorder %s3069_s23, %s3837_s10 }
 0x801   : > { %p3071_p13 = pnand %p3070_p8, %p4008_p6 }
 0x802   : > { %p3076_p1 = por %p3075_p9, %p3074_p2 }
 0x803   : > { %p3072_p3 = pneg %p3071_p13 }
 0x804   : > { %p3078_p4 = por %p3077_p5, %p3076_p1 }
 0x806   : > { %p3079_p12 = pnand %p3078_p4, %p3072_p3 }
 0x808   : > { %3082 = shalt.err (!%p3079_p12)
}
 0x809   : > { %2546 = dma.vmem_to_hbm [thread:$0]  (%p4008_p6), %s3839_s21, 128, %s3837_s10, %s1917_s16  }
 0x80a PF: > { %s4009_s17 = sld [smem:[#allocation35_spill]]  ;;  %s4010_s14 = sld [smem:[#allocation40_spill]] }
 0x80b   : > { %p4012_p0 = scmp.ge.s32.totalorder %s3143_s25, 2 }
 0x810   : > { %s1942_s5 = sand.u32 1, %s4009_s17   ;;  %p4011_p10 = scmp.ne.s32.totalorder %s4010_s14, 0 }
 0x811   : > { %s1943_s15 = scalar_lea.sflag [#allocation10], %s1942_s5 }
 0x812   : > { %p2584_p7 = pnand %p4012_p0, %p4011_p10 }
 0x814   : > { %3126 = dma.done.wait (!%p2584_p7), %s1943_s15, 128  }
 0x815   : > { %3128 = vsyncadd (!%p2584_p7), %s1943_s15, 4294967168  ;;  %s4013_s25 = sld [smem:[#allocation37_spill]]  ;;  %s4014_s9 = sld [smem:[#allocation36_spill]] }
 0x816   : > { %s4015_s3 = sld [smem:[#allocation38_spill]]  ;;  %s4016_s1 = smov %s3135_s24 }
 0x81b   : > { %p49_p11 = scmp.ge.s32.totalorder %s4013_s25, 4   ;;  %s4017_s24 = smov %s4014_s9 }
 0x81d   :  { %51 = sbr.rel (!%p49_p11) target bundleno = 45 (0x2d), region = 201 }
 0x824   :  { %1948 = vsyncpa [#allocation9], 1 }
 0x825   :  { %1950 = vsyncpa [#allocation9 + $0x1], 1 }
 0x826   :  { %1951 = vsyncpa [#allocation12], 1 }
 0x827   :  { %1953 = vsyncpa [#allocation12 + $0x1], 1 }
 0x828   :  { %1954 = vsyncpa [#allocation15], 1 }
 0x829   :  { %1955 = vsyncpa [#allocation18], 1 }
 0x82a   :  { %1956 = vsyncpa [#allocation21], 1 }
 0x82b   :  { %1957 = vsyncpa [#allocation24], 1 }
 0x82c   :  { %1958 = vsyncpa [#allocation10], 1 }
 0x82d   :  { %1960 = vsyncpa [#allocation10 + $0x1], 1 }

</bundles_post_ra>
